<compile_context>
chip_gen: v7x
topology: tpu7x:2x2x1
jax: 0.10.0
libtpu: 0.0.40
codegen_flags: <defaults>
</compile_context>

<pallas_src>
import functools
import math

import jax
import jax.numpy as jnp
import numpy as np
from jax.experimental import pallas as pl
from jax.experimental.pallas import tpu as pltpu


# ------------------------------- kernel --------------------------------------
def _net_p_kernel(h1, hp, h2, h3, c1,
                  x_ref,
                  w1_ref, b1_ref, w2_ref, b2_ref, w3_ref, b3_ref,
                  wh_ref, bh_ref,
                  prelu_ref,
                  y_ref):
    """One batch tile.  Activations are (rows, BT, row_lanes)."""
    bt = x_ref.shape[1]
    a0 = prelu_ref[0]
    a1 = prelu_ref[1]
    a2 = prelu_ref[2]
    a3 = prelu_ref[3]

    def prelu(v, a):
        return jnp.where(v > 0.0, v, a * v)

    def conv3x3(x3, w_ref, b_ref, h_out, slope):
        """3x3 valid conv as 3 banded matmuls (one per kernel row dy)."""
        k = x3.shape[-1]
        n = w_ref.shape[-1]
        acc = None
        for dy in range(3):
            # leading-dim slice + tile-aligned reshape (bt % 8 == 0): no relayout
            lhs = x3[dy:dy + h_out].reshape(h_out * bt, k)
            t = jnp.dot(lhs, w_ref[dy], preferred_element_type=jnp.float32)
            acc = t if acc is None else acc + t
        z = prelu(acc + b_ref[...], slope)
        return z.reshape(h_out, bt, n)

    x3 = x_ref[...]                                        # (h_in, bt, w_in*3)

    # ---- Conv2d(3,10,3) + folded BN + PReLU --------------------------------
    act1 = conv3x3(x3, w1_ref, b1_ref, h1, a0)             # (h1, bt, h1*c1)

    # ---- MaxPool2d(3, stride=2, padding=1) + PReLU -------------------------
    # Row pooling: slab maxima over the (free) leading dim.
    rows = []
    for i in range(hp):
        lo = max(0, 2 * i - 1)
        hi = min(h1, 2 * i + 2)
        m = act1[lo]
        for r in range(lo + 1, hi):
            m = jnp.maximum(m, act1[r])
        rows.append(m)
    rowpool = jnp.stack(rows, axis=0)                      # (hp, bt, h1*c1)

    # Column pooling: max of the row, its left-shifted and right-shifted
    # copies (shift = one w-block of c1 lanes, edge-clamped).  Every lane
    # block w now holds the 3-window max centered at w; only even blocks are
    # consumed downstream (conv2's weight has zero rows at odd blocks), so no
    # stride-2 lane extraction is needed here.
    shift_l = jnp.concatenate([rowpool[..., c1:], rowpool[..., -c1:]], axis=-1)
    shift_r = jnp.concatenate([rowpool[..., :c1], rowpool[..., :-c1]], axis=-1)
    pool_full = prelu(jnp.maximum(jnp.maximum(rowpool, shift_l), shift_r), a1)

    # ---- Conv2d(10,16,3)+BN+PReLU, Conv2d(16,32,3)+BN+PReLU ----------------
    act2 = conv3x3(pool_full, w2_ref, b2_ref, h2, a2)      # (h2, bt, h2*c2)
    feat = conv3x3(act2, w3_ref, b3_ref, h3, a3)           # (h3, bt, h3*c3)

    # ---- fused heads: [1x1(32->1)+BN+Sigmoid | 1x1(32->4)] -----------------
    f2 = feat.reshape(h3 * bt, feat.shape[-1])
    z = jnp.dot(f2, wh_ref[...],
                preferred_element_type=jnp.float32) + bh_ref[...]
    z = z.reshape(h3, bt, h3 * 5)
    # Sigmoid everywhere (EUP exp + approx reciprocal), lane-mask select the
    # sigmoid column (co == 0 of every 5-lane group) — no slice/concat.
    sig = pl.reciprocal(1.0 + jnp.exp(-z), approx=True)
    lane = jax.lax.broadcasted_iota(jnp.int32, z.shape, 2)
    mask = lane == 0
    for xx in range(1, h3):
        mask = jnp.logical_or(mask, lane == 5 * xx)
    y_ref[...] = jnp.where(mask, sig, z)


# ------------------------------- wrapper --------------------------------------
def _choose_bt(n, block_n=128):
    """Images per grid step: multiple of 8, capped, >=2 grid steps when the
    batch is large enough (lets v7x shard the batch over its 2 TensorCores)."""
    if n <= 16:
        return max(8, -(-n // 8) * 8)
    half = -(-((n + 1) // 2) // 8) * 8
    return max(8, min(block_n, half))


def net_p_forward(x_nchw, kp):
    n, c, h_in, w_in = x_nchw.shape
    assert c == 3 and h_in == w_in and h_in == kp["h_in"]
    h1 = h_in - 2                         # 3x3 valid conv
    hp = (h1 - 1) // 2 + 1                # MaxPool2d(3, 2, padding=1)
    h2 = hp - 2
    h3 = h2 - 2
    c1 = kp["c1"]

    bt = _choose_bt(n)
    n_pad = pl.cdiv(n, bt) * bt

    # Host-side re-layout to (H, N, W*C): one fused XLA transpose of a small
    # input; keeps the kernel free of any input relayout.
    x = jnp.transpose(x_nchw, (2, 0, 3, 1)).reshape(h_in, n, w_in * c)
    x = x.astype(jnp.float32)
    if n_pad != n:
        x = jnp.pad(x, ((0, 0), (0, n_pad - n), (0, 0)))

    w1, b1 = kp["w1"], kp["b1"]
    w2, b2 = kp["w2"], kp["b2"]
    w3, b3 = kp["w3"], kp["b3"]
    wh, bh = kp["wh"], kp["bh"]
    prelu = kp["prelu"]

    kernel = functools.partial(_net_p_kernel, h1, hp, h2, h3, c1)

    grid_spec = pltpu.PrefetchScalarGridSpec(
        num_scalar_prefetch=0,
        grid=(n_pad // bt,),
        in_specs=[
            pl.BlockSpec((h_in, bt, w_in * c), lambda i: (0, i, 0)),
            pl.BlockSpec(w1.shape, lambda i: (0, 0, 0)),
            pl.BlockSpec(b1.shape, lambda i: (0, 0)),
            pl.BlockSpec(w2.shape, lambda i: (0, 0, 0)),
            pl.BlockSpec(b2.shape, lambda i: (0, 0)),
            pl.BlockSpec(w3.shape, lambda i: (0, 0, 0)),
            pl.BlockSpec(b3.shape, lambda i: (0, 0)),
            pl.BlockSpec(wh.shape, lambda i: (0, 0)),
            pl.BlockSpec(bh.shape, lambda i: (0, 0)),
            pl.BlockSpec(memory_space=pltpu.MemorySpace.SMEM),   # PReLU slopes
        ],
        out_specs=pl.BlockSpec((h3, bt, h3 * 5), lambda i: (0, i, 0)),
    )

    y = pl.pallas_call(
        kernel,
        grid_spec=grid_spec,
        out_shape=jax.ShapeDtypeStruct((h3, n_pad, h3 * 5), jnp.float32),
        compiler_params=pltpu.CompilerParams(
            dimension_semantics=("parallel",),
            vmem_limit_bytes=32 * 1024 * 1024),
    )(x, w1, b1, w2, b2, w3, b3, wh, bh, prelu)

    y = y[:, :n].reshape(h3, n, h3, 5)        # (y, b, x, co)
    y = jnp.transpose(y, (1, 3, 0, 2))        # (b, co, y, x)
    return y[:, :1], y[:, 1:]                 # sigmoid head (1ch), linear head (4ch)


# ----------------------- deterministic parameter setup -----------------------
def _conv_params(key, cout, cin, kh, kw):
    kw_, kb = jax.random.split(key)
    bound = 1.0 / math.sqrt(cin * kh * kw)
    w = jax.random.uniform(kw_, (cout, cin, kh, kw), jnp.float32, -bound, bound)
    b = jax.random.uniform(kb, (cout,), jnp.float32, -bound, bound)
    return w, b


def _bn_params(key, c):
    k1, k2, k3, k4 = jax.random.split(key, 4)
    gamma = 1.0 + 0.1 * jax.random.normal(k1, (c,), jnp.float32)
    beta = 0.1 * jax.random.normal(k2, (c,), jnp.float32)
    mean = 0.1 * jax.random.normal(k3, (c,), jnp.float32)
    var = jax.random.uniform(k4, (c,), jnp.float32, 0.5, 1.5)
    return gamma, beta, mean, var


def _fold_bn(w_oihw, b, gamma, beta, mean, var, eps=1e-5):
    scale = gamma / jnp.sqrt(var + eps)
    return w_oihw * scale[:, None, None, None], (b - mean) * scale + beta


def init_params(key):
    """Folded (inference-mode BN) PyTorch-layout parameters."""
    keys = jax.random.split(key, 9)
    w1, b1 = _conv_params(keys[0], 10, 3, 3, 3)
    w1, b1 = _fold_bn(w1, b1, *_bn_params(keys[1], 10))
    w2, b2 = _conv_params(keys[2], 16, 10, 3, 3)
    w2, b2 = _fold_bn(w2, b2, *_bn_params(keys[3], 16))
    w3, b3 = _conv_params(keys[4], 32, 16, 3, 3)
    w3, b3 = _fold_bn(w3, b3, *_bn_params(keys[5], 32))
    wp2, bp2 = _conv_params(keys[6], 1, 32, 1, 1)
    wp2, bp2 = _fold_bn(wp2, bp2, *_bn_params(keys[7], 1))
    wp3, bp3 = _conv_params(keys[8], 4, 32, 1, 1)
    prelu = jnp.array([0.25, 0.2, 0.15, 0.1], jnp.float32)
    return dict(w1=w1, b1=b1, w2=w2, b2=b2, w3=w3, b3=b3,
                wp2=wp2, bp2=bp2, wp3=wp3, bp3=bp3, prelu=prelu)


def _banded_weight(w_oihw, w_in_logical, in_lanes, lane_stride):
    """(Cout,Cin,3,3) -> (3, in_lanes, w_out*Cout) banded matmul weights.

    Input lane index of logical column j, channel ci is j*lane_stride*Cin + ci
    (lane_stride=2 consumes the un-extracted stride-2 pooled layout)."""
    w_np = np.asarray(w_oihw, dtype=np.float32)
    cout, cin = w_np.shape[0], w_np.shape[1]
    w_out = w_in_logical - 2
    W = np.zeros((3, in_lanes, w_out * cout), np.float32)
    for dy in range(3):
        for x in range(w_out):
            for dx in range(3):
                r0 = (x + dx) * lane_stride * cin
                W[dy, r0:r0 + cin, x * cout:(x + 1) * cout] = w_np[:, :, dy, dx].T
    return jnp.asarray(W)


def pack_params(rp, h_in):
    """Build kernel-layout (banded / block-diagonal) weights host-side."""
    h1 = h_in - 2
    hp = (h1 - 1) // 2 + 1
    h2 = hp - 2
    h3 = h2 - 2
    c_in = rp["w1"].shape[1]
    c1 = rp["w1"].shape[0]
    c2 = rp["w2"].shape[0]
    c3 = rp["w3"].shape[0]

    w1 = _banded_weight(rp["w1"], h_in, h_in * c_in, 1)     # (3, h_in*3,  h1*c1)
    w2 = _banded_weight(rp["w2"], hp, h1 * c1, 2)           # (3, h1*c1,   h2*c2)
    w3 = _banded_weight(rp["w3"], h2, h2 * c2, 1)           # (3, h2*c2,   h3*c3)
    b1 = jnp.asarray(np.tile(np.asarray(rp["b1"]), h1))[None, :]
    b2 = jnp.asarray(np.tile(np.asarray(rp["b2"]), h2))[None, :]
    b3 = jnp.asarray(np.tile(np.asarray(rp["b3"]), h3))[None, :]

    # fused heads: columns [sigmoid-head(1) | linear-head(4)], block-diag over x
    whcat = np.concatenate([np.asarray(rp["wp2"])[:, :, 0, 0].T,
                            np.asarray(rp["wp3"])[:, :, 0, 0].T], axis=1)   # (32,5)
    bhcat = np.concatenate([np.asarray(rp["bp2"]), np.asarray(rp["bp3"])])  # (5,)
    nh = whcat.shape[1]
    wh = np.zeros((h3 * c3, h3 * nh), np.float32)
    for xx in range(h3):
        wh[xx * c3:(xx + 1) * c3, xx * nh:(xx + 1) * nh] = whcat
    bh = np.tile(bhcat, h3)[None, :]

    return dict(h_in=h_in, c1=c1,
                w1=w1, b1=b1, w2=w2, b2=b2, w3=w3, b3=b3,
                wh=jnp.asarray(wh), bh=jnp.asarray(bh),
                prelu=rp["prelu"])


# ----------------------------- pure-JAX reference ----------------------------
def reference_forward(x_nchw, rp):
    def conv(x, w, b):
        out = jax.lax.conv_general_dilated(
            x, w, window_strides=(1, 1), padding="VALID",
            dimension_numbers=("NCHW", "OIHW", "NCHW"),
            precision=jax.lax.Precision.HIGHEST)
        return out + b[None, :, None, None]

    def prelu(x, a):
        return jnp.where(x > 0.0, x, a * x)

    a = rp["prelu"]
    y = prelu(conv(x_nchw, rp["w1"], rp["b1"]), a[0])
    y = jax.lax.reduce_window(
        y, -jnp.inf, jax.lax.max,
        window_dimensions=(1, 1, 3, 3), window_strides=(1, 1, 2, 2),
        padding=((0, 0), (0, 0), (1, 1), (1, 1)))
    y = prelu(y, a[1])
    y = prelu(conv(y, rp["w2"], rp["b2"]), a[2])
    y = prelu(conv(y, rp["w3"], rp["b3"]), a[3])
    y1 = jax.nn.sigmoid(conv(y, rp["wp2"], rp["bp2"]))
    y2 = conv(y, rp["wp3"], rp["bp3"])
    return y1, y2


if __name__ == "__main__":
    key = jax.random.PRNGKey(0)
    pkey, xkey = jax.random.split(key)
    raw = init_params(pkey)
    kparams = pack_params(raw, h_in=16)
    x = jax.random.normal(xkey, (2, 3, 16, 16), jnp.float32)   # NCHW input

    fwd = jax.jit(lambda xx: net_p_forward(xx, kparams))
    y1, y2 = fwd(x)
    jax.block_until_ready((y1, y2))

    r1, r2 = reference_forward(x, raw)
    assert y1.shape == (2, 1, 3, 3) and y2.shape == (2, 4, 3, 3)
    np.testing.assert_allclose(np.asarray(y1), np.asarray(r1), rtol=5e-3, atol=5e-3)
    np.testing.assert_allclose(np.asarray(y2), np.asarray(r2), rtol=5e-3, atol=5e-3)
    print("KERNEL_OK")
</pallas_src>

<mosaic_0001>
module attributes {stable_mosaic.version = 11 : i64} {
  func.func @_net_p_kernel(%arg0: i32, %arg1: memref<16x8x48xf32, #tpu.memory_space<vmem>>, %arg2: memref<3x48x140xf32, #tpu.memory_space<vmem>>, %arg3: memref<1x140xf32, #tpu.memory_space<vmem>>, %arg4: memref<3x140x80xf32, #tpu.memory_space<vmem>>, %arg5: memref<1x80xf32, #tpu.memory_space<vmem>>, %arg6: memref<3x80x96xf32, #tpu.memory_space<vmem>>, %arg7: memref<1x96xf32, #tpu.memory_space<vmem>>, %arg8: memref<96x15xf32, #tpu.memory_space<vmem>>, %arg9: memref<1x15xf32, #tpu.memory_space<vmem>>, %arg10: memref<4xf32, #tpu.memory_space<smem>>, %arg11: memref<3x8x15xf32, #tpu.memory_space<vmem>>) attributes {dimension_semantics = [#tpu.dimension_semantics<parallel>], iteration_bounds = array<i64: 1>, scalar_prefetch = 0 : i64, scratch_operands = 0 : i64, tpu.core_type = #tpu.core_type<tc>, window_params = [{transform_indices = @transform_0, window_bounds = array<i64: 16, 8, 48>}, {pipeline_mode = #tpu.pipeline_mode<synchronous>, transform_indices = @transform_1, window_bounds = array<i64: 3, 48, 140>}, {pipeline_mode = #tpu.pipeline_mode<synchronous>, transform_indices = @transform_2, window_bounds = array<i64: 1, 140>}, {pipeline_mode = #tpu.pipeline_mode<synchronous>, transform_indices = @transform_3, window_bounds = array<i64: 3, 140, 80>}, {pipeline_mode = #tpu.pipeline_mode<synchronous>, transform_indices = @transform_4, window_bounds = array<i64: 1, 80>}, {pipeline_mode = #tpu.pipeline_mode<synchronous>, transform_indices = @transform_5, window_bounds = array<i64: 3, 80, 96>}, {pipeline_mode = #tpu.pipeline_mode<synchronous>, transform_indices = @transform_6, window_bounds = array<i64: 1, 96>}, {pipeline_mode = #tpu.pipeline_mode<synchronous>, transform_indices = @transform_7, window_bounds = array<i64: 96, 15>}, {pipeline_mode = #tpu.pipeline_mode<synchronous>, transform_indices = @transform_8, window_bounds = array<i64: 1, 15>}, {transform_indices = @transform_9, window_bounds = array<i64: 4>}, {transform_indices = @transform_10, window_bounds = array<i64: 3, 8, 15>}]} {
    %c0 = arith.constant 0 : index
    %0 = memref.load %arg10[%c0] : memref<4xf32, #tpu.memory_space<smem>>
    %c1 = arith.constant 1 : index
    %1 = memref.load %arg10[%c1] : memref<4xf32, #tpu.memory_space<smem>>
    %c2 = arith.constant 2 : index
    %2 = memref.load %arg10[%c2] : memref<4xf32, #tpu.memory_space<smem>>
    %c3 = arith.constant 3 : index
    %3 = memref.load %arg10[%c3] : memref<4xf32, #tpu.memory_space<smem>>
    %c0_0 = arith.constant 0 : index
    %c0_1 = arith.constant 0 : index
    %c0_2 = arith.constant 0 : index
    %4 = vector.load %arg1[%c0_0, %c0_1, %c0_2] : memref<16x8x48xf32, #tpu.memory_space<vmem>>, vector<16x8x48xf32>
    %5 = vector.extract_strided_slice %4 {offsets = [0, 0, 0], sizes = [14, 8, 48], strides = [1, 1, 1]} : vector<16x8x48xf32> to vector<14x8x48xf32>
    %6 = vector.shape_cast %5 : vector<14x8x48xf32> to vector<112x48xf32>
    %c0_3 = arith.constant 0 : index
    %c0_4 = arith.constant 0 : index
    %c0_5 = arith.constant 0 : index
    %7 = vector.load %arg2[%c0_3, %c0_4, %c0_5] : memref<3x48x140xf32, #tpu.memory_space<vmem>>, vector<1x48x140xf32>
    %8 = vector.shape_cast %7 : vector<1x48x140xf32> to vector<48x140xf32>
    %cst = arith.constant dense<0.000000e+00> : vector<112x140xf32>
    %9 = tpu.matmul %6, %8, %cst {dimension_numbers = #tpu.dot_dimension_numbers<[1], [0], [0], [1], [0, 0, 1, 1], [], []>} : vector<112x48xf32>, vector<48x140xf32>, vector<112x140xf32> -> vector<112x140xf32>
    %10 = vector.extract_strided_slice %4 {offsets = [1, 0, 0], sizes = [14, 8, 48], strides = [1, 1, 1]} : vector<16x8x48xf32> to vector<14x8x48xf32>
    %11 = vector.shape_cast %10 : vector<14x8x48xf32> to vector<112x48xf32>
    %c1_6 = arith.constant 1 : index
    %c0_7 = arith.constant 0 : index
    %c0_8 = arith.constant 0 : index
    %12 = vector.load %arg2[%c1_6, %c0_7, %c0_8] : memref<3x48x140xf32, #tpu.memory_space<vmem>>, vector<1x48x140xf32>
    %13 = vector.shape_cast %12 : vector<1x48x140xf32> to vector<48x140xf32>
    %cst_9 = arith.constant dense<0.000000e+00> : vector<112x140xf32>
    %14 = tpu.matmul %11, %13, %cst_9 {dimension_numbers = #tpu.dot_dimension_numbers<[1], [0], [0], [1], [0, 0, 1, 1], [], []>} : vector<112x48xf32>, vector<48x140xf32>, vector<112x140xf32> -> vector<112x140xf32>
    %15 = arith.addf %9, %14 : vector<112x140xf32>
    %16 = vector.extract_strided_slice %4 {offsets = [2, 0, 0], sizes = [14, 8, 48], strides = [1, 1, 1]} : vector<16x8x48xf32> to vector<14x8x48xf32>
    %17 = vector.shape_cast %16 : vector<14x8x48xf32> to vector<112x48xf32>
    %c2_10 = arith.constant 2 : index
    %c0_11 = arith.constant 0 : index
    %c0_12 = arith.constant 0 : index
    %18 = vector.load %arg2[%c2_10, %c0_11, %c0_12] : memref<3x48x140xf32, #tpu.memory_space<vmem>>, vector<1x48x140xf32>
    %19 = vector.shape_cast %18 : vector<1x48x140xf32> to vector<48x140xf32>
    %cst_13 = arith.constant dense<0.000000e+00> : vector<112x140xf32>
    %20 = tpu.matmul %17, %19, %cst_13 {dimension_numbers = #tpu.dot_dimension_numbers<[1], [0], [0], [1], [0, 0, 1, 1], [], []>} : vector<112x48xf32>, vector<48x140xf32>, vector<112x140xf32> -> vector<112x140xf32>
    %21 = arith.addf %15, %20 : vector<112x140xf32>
    %c0_14 = arith.constant 0 : index
    %c0_15 = arith.constant 0 : index
    %22 = vector.load %arg3[%c0_14, %c0_15] : memref<1x140xf32, #tpu.memory_space<vmem>>, vector<1x140xf32>
    %23 = vector.broadcast %22 : vector<1x140xf32> to vector<112x140xf32>
    %24 = arith.addf %21, %23 : vector<112x140xf32>
    %cst_16 = arith.constant 0.000000e+00 : f32
    %25 = vector.broadcast %cst_16 : f32 to vector<112x140xf32>
    %26 = arith.cmpf ogt, %24, %25 : vector<112x140xf32>
    %27 = vector.broadcast %0 : f32 to vector<112x140xf32>
    %28 = arith.mulf %27, %24 : vector<112x140xf32>
    %29 = arith.select %26, %24, %28 : vector<112x140xi1>, vector<112x140xf32>
    %30 = vector.shape_cast %29 : vector<112x140xf32> to vector<14x8x140xf32>
    %31 = vector.extract_strided_slice %30 {offsets = [0, 0, 0], sizes = [1, 8, 140], strides = [1, 1, 1]} : vector<14x8x140xf32> to vector<1x8x140xf32>
    %32 = vector.shape_cast %31 : vector<1x8x140xf32> to vector<8x140xf32>
    %33 = vector.extract_strided_slice %30 {offsets = [1, 0, 0], sizes = [1, 8, 140], strides = [1, 1, 1]} : vector<14x8x140xf32> to vector<1x8x140xf32>
    %34 = vector.shape_cast %33 : vector<1x8x140xf32> to vector<8x140xf32>
    %35 = arith.maximumf %32, %34 : vector<8x140xf32>
    %36 = vector.extract_strided_slice %30 {offsets = [1, 0, 0], sizes = [1, 8, 140], strides = [1, 1, 1]} : vector<14x8x140xf32> to vector<1x8x140xf32>
    %37 = vector.shape_cast %36 : vector<1x8x140xf32> to vector<8x140xf32>
    %38 = vector.extract_strided_slice %30 {offsets = [2, 0, 0], sizes = [1, 8, 140], strides = [1, 1, 1]} : vector<14x8x140xf32> to vector<1x8x140xf32>
    %39 = vector.shape_cast %38 : vector<1x8x140xf32> to vector<8x140xf32>
    %40 = arith.maximumf %37, %39 : vector<8x140xf32>
    %41 = vector.extract_strided_slice %30 {offsets = [3, 0, 0], sizes = [1, 8, 140], strides = [1, 1, 1]} : vector<14x8x140xf32> to vector<1x8x140xf32>
    %42 = vector.shape_cast %41 : vector<1x8x140xf32> to vector<8x140xf32>
    %43 = arith.maximumf %40, %42 : vector<8x140xf32>
    %44 = vector.extract_strided_slice %30 {offsets = [3, 0, 0], sizes = [1, 8, 140], strides = [1, 1, 1]} : vector<14x8x140xf32> to vector<1x8x140xf32>
    %45 = vector.shape_cast %44 : vector<1x8x140xf32> to vector<8x140xf32>
    %46 = vector.extract_strided_slice %30 {offsets = [4, 0, 0], sizes = [1, 8, 140], strides = [1, 1, 1]} : vector<14x8x140xf32> to vector<1x8x140xf32>
    %47 = vector.shape_cast %46 : vector<1x8x140xf32> to vector<8x140xf32>
    %48 = arith.maximumf %45, %47 : vector<8x140xf32>
    %49 = vector.extract_strided_slice %30 {offsets = [5, 0, 0], sizes = [1, 8, 140], strides = [1, 1, 1]} : vector<14x8x140xf32> to vector<1x8x140xf32>
    %50 = vector.shape_cast %49 : vector<1x8x140xf32> to vector<8x140xf32>
    %51 = arith.maximumf %48, %50 : vector<8x140xf32>
    %52 = vector.extract_strided_slice %30 {offsets = [5, 0, 0], sizes = [1, 8, 140], strides = [1, 1, 1]} : vector<14x8x140xf32> to vector<1x8x140xf32>
    %53 = vector.shape_cast %52 : vector<1x8x140xf32> to vector<8x140xf32>
    %54 = vector.extract_strided_slice %30 {offsets = [6, 0, 0], sizes = [1, 8, 140], strides = [1, 1, 1]} : vector<14x8x140xf32> to vector<1x8x140xf32>
    %55 = vector.shape_cast %54 : vector<1x8x140xf32> to vector<8x140xf32>
    %56 = arith.maximumf %53, %55 : vector<8x140xf32>
    %57 = vector.extract_strided_slice %30 {offsets = [7, 0, 0], sizes = [1, 8, 140], strides = [1, 1, 1]} : vector<14x8x140xf32> to vector<1x8x140xf32>
    %58 = vector.shape_cast %57 : vector<1x8x140xf32> to vector<8x140xf32>
    %59 = arith.maximumf %56, %58 : vector<8x140xf32>
    %60 = vector.extract_strided_slice %30 {offsets = [7, 0, 0], sizes = [1, 8, 140], strides = [1, 1, 1]} : vector<14x8x140xf32> to vector<1x8x140xf32>
    %61 = vector.shape_cast %60 : vector<1x8x140xf32> to vector<8x140xf32>
    %62 = vector.extract_strided_slice %30 {offsets = [8, 0, 0], sizes = [1, 8, 140], strides = [1, 1, 1]} : vector<14x8x140xf32> to vector<1x8x140xf32>
    %63 = vector.shape_cast %62 : vector<1x8x140xf32> to vector<8x140xf32>
    %64 = arith.maximumf %61, %63 : vector<8x140xf32>
    %65 = vector.extract_strided_slice %30 {offsets = [9, 0, 0], sizes = [1, 8, 140], strides = [1, 1, 1]} : vector<14x8x140xf32> to vector<1x8x140xf32>
    %66 = vector.shape_cast %65 : vector<1x8x140xf32> to vector<8x140xf32>
    %67 = arith.maximumf %64, %66 : vector<8x140xf32>
    %68 = vector.extract_strided_slice %30 {offsets = [9, 0, 0], sizes = [1, 8, 140], strides = [1, 1, 1]} : vector<14x8x140xf32> to vector<1x8x140xf32>
    %69 = vector.shape_cast %68 : vector<1x8x140xf32> to vector<8x140xf32>
    %70 = vector.extract_strided_slice %30 {offsets = [10, 0, 0], sizes = [1, 8, 140], strides = [1, 1, 1]} : vector<14x8x140xf32> to vector<1x8x140xf32>
    %71 = vector.shape_cast %70 : vector<1x8x140xf32> to vector<8x140xf32>
    %72 = arith.maximumf %69, %71 : vector<8x140xf32>
    %73 = vector.extract_strided_slice %30 {offsets = [11, 0, 0], sizes = [1, 8, 140], strides = [1, 1, 1]} : vector<14x8x140xf32> to vector<1x8x140xf32>
    %74 = vector.shape_cast %73 : vector<1x8x140xf32> to vector<8x140xf32>
    %75 = arith.maximumf %72, %74 : vector<8x140xf32>
    %76 = vector.extract_strided_slice %30 {offsets = [11, 0, 0], sizes = [1, 8, 140], strides = [1, 1, 1]} : vector<14x8x140xf32> to vector<1x8x140xf32>
    %77 = vector.shape_cast %76 : vector<1x8x140xf32> to vector<8x140xf32>
    %78 = vector.extract_strided_slice %30 {offsets = [12, 0, 0], sizes = [1, 8, 140], strides = [1, 1, 1]} : vector<14x8x140xf32> to vector<1x8x140xf32>
    %79 = vector.shape_cast %78 : vector<1x8x140xf32> to vector<8x140xf32>
    %80 = arith.maximumf %77, %79 : vector<8x140xf32>
    %81 = vector.extract_strided_slice %30 {offsets = [13, 0, 0], sizes = [1, 8, 140], strides = [1, 1, 1]} : vector<14x8x140xf32> to vector<1x8x140xf32>
    %82 = vector.shape_cast %81 : vector<1x8x140xf32> to vector<8x140xf32>
    %83 = arith.maximumf %80, %82 : vector<8x140xf32>
    %84 = vector.shape_cast %35 : vector<8x140xf32> to vector<1x8x140xf32>
    %85 = vector.shape_cast %43 : vector<8x140xf32> to vector<1x8x140xf32>
    %86 = vector.shape_cast %51 : vector<8x140xf32> to vector<1x8x140xf32>
    %87 = vector.shape_cast %59 : vector<8x140xf32> to vector<1x8x140xf32>
    %88 = vector.shape_cast %67 : vector<8x140xf32> to vector<1x8x140xf32>
    %89 = vector.shape_cast %75 : vector<8x140xf32> to vector<1x8x140xf32>
    %90 = vector.shape_cast %83 : vector<8x140xf32> to vector<1x8x140xf32>
    %91 = tpu.concatenate %84, %85, %86, %87, %88, %89, %90 in 0 : vector<1x8x140xf32>, vector<1x8x140xf32>, vector<1x8x140xf32>, vector<1x8x140xf32>, vector<1x8x140xf32>, vector<1x8x140xf32>, vector<1x8x140xf32> -> vector<7x8x140xf32>
    %92 = vector.extract_strided_slice %91 {offsets = [0, 0, 10], sizes = [7, 8, 130], strides = [1, 1, 1]} : vector<7x8x140xf32> to vector<7x8x130xf32>
    %93 = vector.extract_strided_slice %91 {offsets = [0, 0, 130], sizes = [7, 8, 10], strides = [1, 1, 1]} : vector<7x8x140xf32> to vector<7x8x10xf32>
    %94 = tpu.concatenate %92, %93 in 2 : vector<7x8x130xf32>, vector<7x8x10xf32> -> vector<7x8x140xf32>
    %95 = vector.extract_strided_slice %91 {offsets = [0, 0, 0], sizes = [7, 8, 10], strides = [1, 1, 1]} : vector<7x8x140xf32> to vector<7x8x10xf32>
    %96 = vector.extract_strided_slice %91 {offsets = [0, 0, 0], sizes = [7, 8, 130], strides = [1, 1, 1]} : vector<7x8x140xf32> to vector<7x8x130xf32>
    %97 = tpu.concatenate %95, %96 in 2 : vector<7x8x10xf32>, vector<7x8x130xf32> -> vector<7x8x140xf32>
    %98 = arith.maximumf %91, %94 : vector<7x8x140xf32>
    %99 = arith.maximumf %98, %97 : vector<7x8x140xf32>
    %cst_17 = arith.constant 0.000000e+00 : f32
    %100 = vector.broadcast %cst_17 : f32 to vector<7x8x140xf32>
    %101 = arith.cmpf ogt, %99, %100 : vector<7x8x140xf32>
    %102 = vector.broadcast %1 : f32 to vector<7x8x140xf32>
    %103 = arith.mulf %102, %99 : vector<7x8x140xf32>
    %104 = arith.select %101, %99, %103 : vector<7x8x140xi1>, vector<7x8x140xf32>
    %105 = vector.extract_strided_slice %104 {offsets = [0, 0, 0], sizes = [5, 8, 140], strides = [1, 1, 1]} : vector<7x8x140xf32> to vector<5x8x140xf32>
    %106 = vector.shape_cast %105 : vector<5x8x140xf32> to vector<40x140xf32>
    %c0_18 = arith.constant 0 : index
    %c0_19 = arith.constant 0 : index
    %c0_20 = arith.constant 0 : index
    %107 = vector.load %arg4[%c0_18, %c0_19, %c0_20] : memref<3x140x80xf32, #tpu.memory_space<vmem>>, vector<1x140x80xf32>
    %108 = vector.shape_cast %107 : vector<1x140x80xf32> to vector<140x80xf32>
    %cst_21 = arith.constant dense<0.000000e+00> : vector<40x80xf32>
    %109 = tpu.matmul %106, %108, %cst_21 {dimension_numbers = #tpu.dot_dimension_numbers<[1], [0], [0], [1], [0, 0, 1, 1], [], []>} : vector<40x140xf32>, vector<140x80xf32>, vector<40x80xf32> -> vector<40x80xf32>
    %110 = vector.extract_strided_slice %104 {offsets = [1, 0, 0], sizes = [5, 8, 140], strides = [1, 1, 1]} : vector<7x8x140xf32> to vector<5x8x140xf32>
    %111 = vector.shape_cast %110 : vector<5x8x140xf32> to vector<40x140xf32>
    %c1_22 = arith.constant 1 : index
    %c0_23 = arith.constant 0 : index
    %c0_24 = arith.constant 0 : index
    %112 = vector.load %arg4[%c1_22, %c0_23, %c0_24] : memref<3x140x80xf32, #tpu.memory_space<vmem>>, vector<1x140x80xf32>
    %113 = vector.shape_cast %112 : vector<1x140x80xf32> to vector<140x80xf32>
    %cst_25 = arith.constant dense<0.000000e+00> : vector<40x80xf32>
    %114 = tpu.matmul %111, %113, %cst_25 {dimension_numbers = #tpu.dot_dimension_numbers<[1], [0], [0], [1], [0, 0, 1, 1], [], []>} : vector<40x140xf32>, vector<140x80xf32>, vector<40x80xf32> -> vector<40x80xf32>
    %115 = arith.addf %109, %114 : vector<40x80xf32>
    %116 = vector.extract_strided_slice %104 {offsets = [2, 0, 0], sizes = [5, 8, 140], strides = [1, 1, 1]} : vector<7x8x140xf32> to vector<5x8x140xf32>
    %117 = vector.shape_cast %116 : vector<5x8x140xf32> to vector<40x140xf32>
    %c2_26 = arith.constant 2 : index
    %c0_27 = arith.constant 0 : index
    %c0_28 = arith.constant 0 : index
    %118 = vector.load %arg4[%c2_26, %c0_27, %c0_28] : memref<3x140x80xf32, #tpu.memory_space<vmem>>, vector<1x140x80xf32>
    %119 = vector.shape_cast %118 : vector<1x140x80xf32> to vector<140x80xf32>
    %cst_29 = arith.constant dense<0.000000e+00> : vector<40x80xf32>
    %120 = tpu.matmul %117, %119, %cst_29 {dimension_numbers = #tpu.dot_dimension_numbers<[1], [0], [0], [1], [0, 0, 1, 1], [], []>} : vector<40x140xf32>, vector<140x80xf32>, vector<40x80xf32> -> vector<40x80xf32>
    %121 = arith.addf %115, %120 : vector<40x80xf32>
    %c0_30 = arith.constant 0 : index
    %c0_31 = arith.constant 0 : index
    %122 = vector.load %arg5[%c0_30, %c0_31] : memref<1x80xf32, #tpu.memory_space<vmem>>, vector<1x80xf32>
    %123 = vector.broadcast %122 : vector<1x80xf32> to vector<40x80xf32>
    %124 = arith.addf %121, %123 : vector<40x80xf32>
    %cst_32 = arith.constant 0.000000e+00 : f32
    %125 = vector.broadcast %cst_32 : f32 to vector<40x80xf32>
    %126 = arith.cmpf ogt, %124, %125 : vector<40x80xf32>
    %127 = vector.broadcast %2 : f32 to vector<40x80xf32>
    %128 = arith.mulf %127, %124 : vector<40x80xf32>
    %129 = arith.select %126, %124, %128 : vector<40x80xi1>, vector<40x80xf32>
    %130 = vector.shape_cast %129 : vector<40x80xf32> to vector<5x8x80xf32>
    %131 = vector.extract_strided_slice %130 {offsets = [0, 0, 0], sizes = [3, 8, 80], strides = [1, 1, 1]} : vector<5x8x80xf32> to vector<3x8x80xf32>
    %132 = vector.shape_cast %131 : vector<3x8x80xf32> to vector<24x80xf32>
    %c0_33 = arith.constant 0 : index
    %c0_34 = arith.constant 0 : index
    %c0_35 = arith.constant 0 : index
    %133 = vector.load %arg6[%c0_33, %c0_34, %c0_35] : memref<3x80x96xf32, #tpu.memory_space<vmem>>, vector<1x80x96xf32>
    %134 = vector.shape_cast %133 : vector<1x80x96xf32> to vector<80x96xf32>
    %cst_36 = arith.constant dense<0.000000e+00> : vector<24x96xf32>
    %135 = tpu.matmul %132, %134, %cst_36 {dimension_numbers = #tpu.dot_dimension_numbers<[1], [0], [0], [1], [0, 0, 1, 1], [], []>} : vector<24x80xf32>, vector<80x96xf32>, vector<24x96xf32> -> vector<24x96xf32>
    %136 = vector.extract_strided_slice %130 {offsets = [1, 0, 0], sizes = [3, 8, 80], strides = [1, 1, 1]} : vector<5x8x80xf32> to vector<3x8x80xf32>
    %137 = vector.shape_cast %136 : vector<3x8x80xf32> to vector<24x80xf32>
    %c1_37 = arith.constant 1 : index
    %c0_38 = arith.constant 0 : index
    %c0_39 = arith.constant 0 : index
    %138 = vector.load %arg6[%c1_37, %c0_38, %c0_39] : memref<3x80x96xf32, #tpu.memory_space<vmem>>, vector<1x80x96xf32>
    %139 = vector.shape_cast %138 : vector<1x80x96xf32> to vector<80x96xf32>
    %cst_40 = arith.constant dense<0.000000e+00> : vector<24x96xf32>
    %140 = tpu.matmul %137, %139, %cst_40 {dimension_numbers = #tpu.dot_dimension_numbers<[1], [0], [0], [1], [0, 0, 1, 1], [], []>} : vector<24x80xf32>, vector<80x96xf32>, vector<24x96xf32> -> vector<24x96xf32>
    %141 = arith.addf %135, %140 : vector<24x96xf32>
    %142 = vector.extract_strided_slice %130 {offsets = [2, 0, 0], sizes = [3, 8, 80], strides = [1, 1, 1]} : vector<5x8x80xf32> to vector<3x8x80xf32>
    %143 = vector.shape_cast %142 : vector<3x8x80xf32> to vector<24x80xf32>
    %c2_41 = arith.constant 2 : index
    %c0_42 = arith.constant 0 : index
    %c0_43 = arith.constant 0 : index
    %144 = vector.load %arg6[%c2_41, %c0_42, %c0_43] : memref<3x80x96xf32, #tpu.memory_space<vmem>>, vector<1x80x96xf32>
    %145 = vector.shape_cast %144 : vector<1x80x96xf32> to vector<80x96xf32>
    %cst_44 = arith.constant dense<0.000000e+00> : vector<24x96xf32>
    %146 = tpu.matmul %143, %145, %cst_44 {dimension_numbers = #tpu.dot_dimension_numbers<[1], [0], [0], [1], [0, 0, 1, 1], [], []>} : vector<24x80xf32>, vector<80x96xf32>, vector<24x96xf32> -> vector<24x96xf32>
    %147 = arith.addf %141, %146 : vector<24x96xf32>
    %c0_45 = arith.constant 0 : index
    %c0_46 = arith.constant 0 : index
    %148 = vector.load %arg7[%c0_45, %c0_46] : memref<1x96xf32, #tpu.memory_space<vmem>>, vector<1x96xf32>
    %149 = vector.broadcast %148 : vector<1x96xf32> to vector<24x96xf32>
    %150 = arith.addf %147, %149 : vector<24x96xf32>
    %cst_47 = arith.constant 0.000000e+00 : f32
    %151 = vector.broadcast %cst_47 : f32 to vector<24x96xf32>
    %152 = arith.cmpf ogt, %150, %151 : vector<24x96xf32>
    %153 = vector.broadcast %3 : f32 to vector<24x96xf32>
    %154 = arith.mulf %153, %150 : vector<24x96xf32>
    %155 = arith.select %152, %150, %154 : vector<24x96xi1>, vector<24x96xf32>
    %156 = vector.shape_cast %155 : vector<24x96xf32> to vector<3x8x96xf32>
    %157 = vector.shape_cast %156 : vector<3x8x96xf32> to vector<24x96xf32>
    %c0_48 = arith.constant 0 : index
    %c0_49 = arith.constant 0 : index
    %158 = vector.load %arg8[%c0_48, %c0_49] : memref<96x15xf32, #tpu.memory_space<vmem>>, vector<96x15xf32>
    %cst_50 = arith.constant dense<0.000000e+00> : vector<24x15xf32>
    %159 = tpu.matmul %157, %158, %cst_50 {dimension_numbers = #tpu.dot_dimension_numbers<[1], [0], [0], [1], [0, 0, 1, 1], [], []>} : vector<24x96xf32>, vector<96x15xf32>, vector<24x15xf32> -> vector<24x15xf32>
    %c0_51 = arith.constant 0 : index
    %c0_52 = arith.constant 0 : index
    %160 = vector.load %arg9[%c0_51, %c0_52] : memref<1x15xf32, #tpu.memory_space<vmem>>, vector<1x15xf32>
    %161 = vector.broadcast %160 : vector<1x15xf32> to vector<24x15xf32>
    %162 = arith.addf %159, %161 : vector<24x15xf32>
    %163 = vector.shape_cast %162 : vector<24x15xf32> to vector<3x8x15xf32>
    %cst_53 = arith.constant 0.000000e+00 : f32
    %164 = vector.broadcast %cst_53 : f32 to vector<3x8x15xf32>
    %165 = arith.subf %164, %163 : vector<3x8x15xf32>
    %166 = math.exp %165 : vector<3x8x15xf32>
    %cst_54 = arith.constant 1.000000e+00 : f32
    %167 = vector.broadcast %cst_54 : f32 to vector<3x8x15xf32>
    %168 = arith.addf %167, %166 : vector<3x8x15xf32>
    %169 = tpu.reciprocal %168 {approx = true} : vector<3x8x15xf32> -> vector<3x8x15xf32>
    %170 = tpu.iota {dimensions = array<i32: 2>} : vector<3x8x15xi32>
    %c0_i32 = arith.constant 0 : i32
    %171 = vector.broadcast %c0_i32 : i32 to vector<3x8x15xi32>
    %172 = arith.cmpi eq, %170, %171 : vector<3x8x15xi32>
    %c5_i32 = arith.constant 5 : i32
    %173 = vector.broadcast %c5_i32 : i32 to vector<3x8x15xi32>
    %174 = arith.cmpi eq, %170, %173 : vector<3x8x15xi32>
    %175 = arith.ori %172, %174 : vector<3x8x15xi1>
    %c10_i32 = arith.constant 10 : i32
    %176 = vector.broadcast %c10_i32 : i32 to vector<3x8x15xi32>
    %177 = arith.cmpi eq, %170, %176 : vector<3x8x15xi32>
    %178 = arith.ori %175, %177 : vector<3x8x15xi1>
    %179 = arith.select %178, %169, %163 : vector<3x8x15xi1>, vector<3x8x15xf32>
    %c0_55 = arith.constant 0 : index
    %c0_56 = arith.constant 0 : index
    %c0_57 = arith.constant 0 : index
    %180 = vector.load %arg11[%c0_55, %c0_56, %c0_57] : memref<3x8x15xf32, #tpu.memory_space<vmem>>, vector<3x8x15xf32>
    tpu.vector_store %arg11[%c0_55, %c0_56, %c0_57], %179 {strides = array<i32>} : memref<3x8x15xf32, #tpu.memory_space<vmem>>, vector<3x8x15xf32>,
    return
  }
  func.func @transform_0(%arg0: i32) -> (i32, i32, i32) {
    %c0_i32 = arith.constant 0 : i32
    %c0_i32_0 = arith.constant 0 : i32
    %c0_i32_1 = arith.constant 0 : i32
    return %c0_i32, %arg0, %c0_i32_0 : i32, i32, i32
  }
  func.func @transform_1(%arg0: i32) -> (i32, i32, i32) {
    %c0_i32 = arith.constant 0 : i32
    %c0_i32_0 = arith.constant 0 : i32
    %c0_i32_1 = arith.constant 0 : i32
    %c0_i32_2 = arith.constant 0 : i32
    return %c0_i32, %c0_i32_0, %c0_i32_1 : i32, i32, i32
  }
  func.func @transform_2(%arg0: i32) -> (i32, i32) {
    %c0_i32 = arith.constant 0 : i32
    %c0_i32_0 = arith.constant 0 : i32
    %c0_i32_1 = arith.constant 0 : i32
    return %c0_i32, %c0_i32_0 : i32, i32
  }
  func.func @transform_3(%arg0: i32) -> (i32, i32, i32) {
    %c0_i32 = arith.constant 0 : i32
    %c0_i32_0 = arith.constant 0 : i32
    %c0_i32_1 = arith.constant 0 : i32
    %c0_i32_2 = arith.constant 0 : i32
    return %c0_i32, %c0_i32_0, %c0_i32_1 : i32, i32, i32
  }
  func.func @transform_4(%arg0: i32) -> (i32, i32) {
    %c0_i32 = arith.constant 0 : i32
    %c0_i32_0 = arith.constant 0 : i32
    %c0_i32_1 = arith.constant 0 : i32
    return %c0_i32, %c0_i32_0 : i32, i32
  }
  func.func @transform_5(%arg0: i32) -> (i32, i32, i32) {
    %c0_i32 = arith.constant 0 : i32
    %c0_i32_0 = arith.constant 0 : i32
    %c0_i32_1 = arith.constant 0 : i32
    %c0_i32_2 = arith.constant 0 : i32
    return %c0_i32, %c0_i32_0, %c0_i32_1 : i32, i32, i32
  }
  func.func @transform_6(%arg0: i32) -> (i32, i32) {
    %c0_i32 = arith.constant 0 : i32
    %c0_i32_0 = arith.constant 0 : i32
    %c0_i32_1 = arith.constant 0 : i32
    return %c0_i32, %c0_i32_0 : i32, i32
  }
  func.func @transform_7(%arg0: i32) -> (i32, i32) {
    %c0_i32 = arith.constant 0 : i32
    %c0_i32_0 = arith.constant 0 : i32
    %c0_i32_1 = arith.constant 0 : i32
    return %c0_i32, %c0_i32_0 : i32, i32
  }
  func.func @transform_8(%arg0: i32) -> (i32, i32) {
    %c0_i32 = arith.constant 0 : i32
    %c0_i32_0 = arith.constant 0 : i32
    %c0_i32_1 = arith.constant 0 : i32
    return %c0_i32, %c0_i32_0 : i32, i32
  }
  func.func @transform_9(%arg0: i32) -> i32 {
    %c0_i32 = arith.constant 0 : i32
    %c0_i32_0 = arith.constant 0 : i32
    return %c0_i32 : i32
  }
  func.func @transform_10(%arg0: i32) -> (i32, i32, i32) {
    %c0_i32 = arith.constant 0 : i32
    %c0_i32_0 = arith.constant 0 : i32
    %c0_i32_1 = arith.constant 0 : i32
    return %c0_i32, %arg0, %c0_i32_0 : i32, i32, i32
  }
}

</mosaic_0001>

<bundles_post_ra>
// kernel: _lambda_.1
= control target key start
LH: loop header
LB: loop body
LE: loop exit
PB: predicated region body
PF: predicated region fallthrough
CT: control target
= control target key end

     0   :  { %15 = vsyncpa [#allocation3], 0  ;;  %s3392_s0 = inlined_call_operand.vmem [shape: f32[16,8,48], index: 0, kind: input, shape index: {}]   ;;  %s3393_s1 = inlined_call_operand.hbm [shape: f32[3,48,140], index: 1, kind: input, shape index: {}]   ;;  %s3394_s2 = inlined_call_operand.vmem [shape: f32[1,140], index: 2, kind: input, shape index: {}]   ;;  %s3395_s3 = inlined_call_operand.vmem [shape: f32[3,140,80], index: 3, kind: input, shape index: {}]   ;;  %s3396_s4 = inlined_call_operand.vmem [shape: f32[1,80], index: 4, kind: input, shape index: {}]   ;;  %s3397_s5 = inlined_call_operand.hbm [shape: f32[3,80,96], index: 5, kind: input, shape index: {}]   ;;  %s3398_s6 = inlined_call_operand.vmem [shape: f32[1,96], index: 6, kind: input, shape index: {}]   ;;  %s3399_s7 = inlined_call_operand.hbm [shape: f32[96,15], index: 7, kind: input, shape index: {}]   ;;  %s3400_s8 = inlined_call_operand.vmem [shape: f32[1,15], index: 8, kind: input, shape index: {}]   ;;  %s3401_s9 = inlined_call_operand.vmem [shape: f32[4], index: 9, kind: input, shape index: {}]   ;;  %s3402_s10 = inlined_call_operand.vmem [shape: f32[3,8,15], index: 10, kind: output, shape index: {}]  }
   0x1   :  { %16 = vsyncpa [#allocation6], 0 }
   0x2   :  { %17 = vsyncpa [#allocation4], 0  ;;  %s2506_s13 = smov [#allocation5]   ;;  %s2422_s17 = scalar_lea.hbm %s3397_s5, 3840 }
   0x3   :  { %s43_s14 = sshll.u32 %s2506_s13, 4  ;;  %p2423_p0 = scmp.ne.s32.totalorder %s3397_s5, %s2422_s17  ;;  %s44_s14 = int_to_ptr.vmem [resolvable:$true] %s43_s14 }
   0x4   :  { %p2426_p1 = scmp.lt.u32.totalorder %s2422_s17, %s3397_s5 }
   0x6   :  { %p2428_p2 = pnand %p2426_p1, %p2423_p0 }
   0x8   :  { %2431 = shalt.err (!%p2428_p2)
}
   0x9   :  { %s2432_s22 = scalar_lea.vmem %s44_s14, 3840  ;;  %p2437_p4 = scmp.lt.s32.totalorder %s44_s14, %s44_s14 }
   0xa   :  { %p2433_p3 = scmp.ne.s32.totalorder %s44_s14, %s2432_s22  ;;  %p2438_p5 = scmp.lt.s32.totalorder %s2432_s22, %s2432_s22 }
   0xc   :  { %p2439_p6 = por %p2438_p5, %p2437_p4 }
   0xe   :  { %p2440_p7 = pnand %p2439_p6, %p2433_p3 }
  0x10   :  { %2443 = shalt.err (!%p2440_p7)
}
  0x11   :  { %s2507_s23 = smov 128   ;;  %s2508_s24 = smov 8  }
  0x12   :  { %49 = dma.hbm_to_vmem [thread:$0]  %s3397_s5, 3840, %s44_s14, [#allocation6], %s2507_s23, %s2507_s23, %s2508_s24  }
  0x13   :  { %s2509_s27 = smov [#allocation2]   ;;  %s2444_s11 = scalar_lea.hbm %s3393_s1, 4608 }
  0x14   :  { %s25_s28 = sshll.u32 %s2509_s27, 4  ;;  %p2445_p8 = scmp.ne.s32.totalorder %s3393_s1, %s2444_s11  ;;  %s26_s28 = int_to_ptr.vmem [resolvable:$true] %s25_s28 }
  0x15   :  { %p2448_p9 = scmp.lt.u32.totalorder %s2444_s11, %s3393_s1 }
  0x17   :  { %p2450_p10 = pnand %p2448_p9, %p2445_p8 }
  0x19   :  { %2453 = shalt.err (!%p2450_p10)
}
  0x1a   :  { %s2454_s17 = scalar_lea.vmem %s26_s28, 4608  ;;  %p2459_p12 = scmp.lt.s32.totalorder %s26_s28, %s26_s28 }
  0x1b   :  { %p2455_p11 = scmp.ne.s32.totalorder %s26_s28, %s2454_s17  ;;  %p2460_p13 = scmp.lt.s32.totalorder %s2454_s17, %s2454_s17 }
  0x1d   :  { %p2461_p0 = por %p2460_p13, %p2459_p12 }
  0x1f   :  { %p2462_p1 = pnand %p2461_p0, %p2455_p11 }
  0x21   :  { %2465 = shalt.err (!%p2462_p1)
}
  0x22   :  { %s2510_s5 = smov 256   ;;  %s2511_s14 = smov 16  }
  0x23   :  { %31 = dma.hbm_to_vmem [thread:$0]  %s3393_s1, 4608, %s26_s28, [#allocation3], %s2510_s5, %s2510_s5, %s2511_s14  }
  0x24   :  { %s72_s22 = sshll.u32 %s3401_s9, 4  ;;  %s2512_s25 = smov [#allocation7]   ;;  %s73_s22 = int_to_ptr.vmem [resolvable:$true] %s72_s22 }
  0x25   :  { %s57_s26 = sshll.u32 %s2512_s25, 4  ;;  %s2466_s30 = scalar_lea.hbm %s3399_s7, 1536  ;;  %s58_s26 = int_to_ptr.vmem [resolvable:$true] %s57_s26 }
  0x26   :  { %p2467_p2 = scmp.ne.s32.totalorder %s3399_s7, %s2466_s30  ;;  %p2470_p3 = scmp.lt.u32.totalorder %s2466_s30, %s3399_s7 }
  0x28   :  { %p2472_p4 = pnand %p2470_p3, %p2467_p2 }
  0x2a   :  { %2475 = shalt.err (!%p2472_p4)
}
  0x2b   :  { %s2476_s1 = scalar_lea.vmem %s58_s26, 1536  ;;  %p2481_p6 = scmp.lt.s32.totalorder %s58_s26, %s58_s26 }
  0x2c   :  { %p2477_p5 = scmp.ne.s32.totalorder %s58_s26, %s2476_s1  ;;  %p2482_p7 = scmp.lt.s32.totalorder %s2476_s1, %s2476_s1 }
  0x2e   :  { %p2483_p8 = por %p2482_p7, %p2481_p6 }
  0x30   :  { %p2484_p9 = pnand %p2483_p8, %p2477_p5 }
  0x32   :  { %2487 = shalt.err (!%p2484_p9)
}
  0x33   :  { %63 = dma.hbm_to_vmem [thread:$0]  %s3399_s7, 1536, %s58_s26, [#allocation6], %s2507_s23, %s2507_s23, %s2508_s24  }
  0x34   :  { %s2488_s16 = scalar_lea.vmem %s73_s22, 16  ;;  %p2493_p11 = scmp.lt.s32.totalorder %s73_s22, %s73_s22 }
  0x35   :  { %p2489_p10 = scmp.ne.s32.totalorder %s73_s22, %s2488_s16  ;;  %p2494_p12 = scmp.lt.s32.totalorder %s2488_s16, %s2488_s16 }
  0x37   :  { %p2495_p13 = por %p2494_p12, %p2493_p11 }
  0x39   :  { %p2496_p0 = pnand %p2495_p13, %p2489_p10 }
  0x3b   :  { %2499 = shalt.err (!%p2496_p0)
}
  0x3c   :  { %s2513_s17 = smov [#allocation8]  }
  0x3d   :  { %75 = dma.vmem_to_smem %s73_s22, 16, %s2513_s17, [#allocation4]  }
  0x3e   :  { %2500 = dma.done.wait [#allocation3], 4608  }
  0x3f   :  { %2501 = vsyncadd [#allocation3], 4294962688 }
  0x40   :  { %2502 = dma.done.wait [#allocation6], 5376  }
  0x41   :  { %2503 = vsyncadd [#allocation6], 4294961920 }
  0x42   :  { %2504 = dma.done.wait [#allocation4], 16  }
  0x43   :  { %2505 = vsyncadd [#allocation4], 4294967280 }
  0x44   :  { %88 = sfence }
  0x45   :  { %v123_v0 = vld [vmem:[#allocation2 + $0x68] sm:$0xff]  ;;  %v125_v1 = vld [vmem:[#allocation2 + $0x78] sm:$0xff]  ;;  %v122_v2 = vld [vmem:[#allocation2 + $0x60] sm:$0xff]  ;;  %v2514_v7 = vmov 0.0   ;;  %vm134_vm0 = vcmask 392192   ;;  %s89_s20 = sld [smem:[#allocation8]] }
  0x46   :  { %v2157_v3 = vpack.c.bf16 %v125_v1, %v123_v0  ;;  %v124_v4 = vld [vmem:[#allocation2 + $0x70] sm:$0xff]  ;;  %v127_v5 = vld [vmem:[#allocation2 + $0x88] sm:$0xff]  ;;  %v129_v6 = vld [vmem:[#allocation2 + $0x98] sm:$0xff]  ;;  %241 = vmatprep.mubr.f32.mxu0 %v2514_v7  ;;  %vm1075_vm8 = vcmask 1043456   ;;  %vm2516_vm10 = vmmov 1   ;;  %s2517_s9 = smov 10  }
  0x47   :  { %v2159_v8 = vpack.c.bf16 %v124_v4, %v122_v2  ;;  %v2161_v9 = vpack.c.bf16 %v129_v6, %v127_v5  ;;  %v126_v10 = vld [vmem:[#allocation2 + $0x80] sm:$0xff]  ;;  %v128_v11 = vld [vmem:[#allocation2 + $0x90] sm:$0xff]  ;;  %v131_v12 = vld [vmem:[#allocation2 + $0xa8] sm:$0xff]  ;;  %s2518_s28 = smov 118   ;;  %s1869_s16 = sld [smem:[#allocation8 + $0x1]] }
  0x48   :  { %2158 = vmatprep.subr.bf16.mxu0 %v2157_v3  ;;  %v133_v13 = vld [vmem:[#allocation2 + $0xb8] sm:$0xff]  ;;  %v2163_v14 = vpack.c.bf16 %v128_v11, %v126_v10  ;;  %v130_v16 = vld [vmem:[#allocation2 + $0xa0] sm:$0xff]  ;;  %v132_v17 = vld [vmem:[#allocation2 + $0xb0] sm:$0xff]  ;;  %v2515_v11 = vmov 0.0|0.0  }
  0x49   :  { %2160 = vmatpush1.bf16.msra.mxu0 %v2159_v8  ;;  %v2165_v15 = vpack.c.bf16 %v133_v13, %v131_v12  ;;  %v110_v18 = vld [vmem:[#allocation2 + $0x8] sm:$0xff]  ;;  %v112_v19 = vld [vmem:[#allocation2 + $0x18] sm:$0xff]  ;;  %v2167_v20 = vpack.c.bf16 %v132_v17, %v130_v16  ;;  %v109_v22 = vld [vmem:[#allocation2] sm:$0xff]  ;;  %2193 = vmatprep.subr.bf16.mxu1 %v2515_v11 }
  0x4a   :  { %2162 = vmatprep.subr.bf16.mxu0 %v2161_v9  ;;  %v2169_v21 = vpack.c.bf16 %v112_v19, %v110_v18  ;;  %v111_v23 = vld [vmem:[#allocation2 + $0x10] sm:$0xff]  ;;  %v114_v24 = vld [vmem:[#allocation2 + $0x28] sm:$0xff]  ;;  %v116_v25 = vld [vmem:[#allocation2 + $0x38] sm:$0xff] }
  0x4b   :  { %v2624_v26 = vld [vmem:[%s3392_s0 + $0x8] sm:$0xff]  ;;  %v2171_v27 = vpack.c.bf16 %v111_v23, %v109_v22  ;;  %v2173_v28 = vpack.c.bf16 %v116_v25, %v114_v24  ;;  %v113_v29 = vld [vmem:[#allocation2 + $0x20] sm:$0xff]  ;;  %v115_v30 = vld [vmem:[#allocation2 + $0x30] sm:$0xff] }
  0x4c   :  { %v118_v31 = vld [vmem:[#allocation2 + $0x48] sm:$0xff]  ;;  %v120_v32 = vld [vmem:[#allocation2 + $0x58] sm:$0xff]  ;;  %v2632_v33 = vld [vmem:[%s3392_s0 + $0x10] sm:$0xff]  ;;  %v2175_v34 = vpack.c.bf16 %v115_v30, %v113_v29 }
  0x4d   :  { %2164 = vmatpush1.bf16.msra.mxu0 %v2163_v14  ;;  %v2177_v35 = vpack.c.bf16 %v120_v32, %v118_v31  ;;  %v117_v36 = vld [vmem:[#allocation2 + $0x40] sm:$0xff]  ;;  %v119_v37 = vld [vmem:[#allocation2 + $0x50] sm:$0xff]  ;;  %v480_v38 = vld [vmem:[#allocation2 + $0xc8] sm:$0xff] }
  0x4e   :  { %2166 = vmatprep.subr.bf16.mxu0 %v2165_v15  ;;  %v482_v39 = vld [vmem:[#allocation2 + $0xd8] sm:$0xff]  ;;  %v2179_v41 = vpack.c.bf16 %v119_v37, %v117_v36  ;;  %v2648_v43 = vld [vmem:[%s3392_s0 + $0x20] sm:$0xff]  ;;  %v2656_v44 = vld [vmem:[%s3392_s0 + $0x28] sm:$0xff]  ;;  %v2873_v37 = vstv %s89_s20 }
  0x4f   :  { %v2640_v40 = vld [vmem:[%s3392_s0 + $0x18] sm:$0xff]  ;;  %v2181_v42 = vpack.c.bf16 %v482_v39, %v480_v38  ;;  %v2664_v45 = vld [vmem:[%s3392_s0 + $0x30] sm:$0xff]  ;;  %v2680_v47 = vld [vmem:[%s3392_s0 + $0x40] sm:$0xff] }
  0x50   :  { %v2672_v46 = vld [vmem:[%s3392_s0 + $0x38] sm:$0xff]  ;;  %v2688_v48 = vld [vmem:[%s3392_s0 + $0x48] sm:$0xff]  ;;  %v2696_v49 = vld [vmem:[%s3392_s0 + $0x50] sm:$0xff] }
  0x51   :  { %2168 = vmatpush1.bf16.msra.mxu0 %v2167_v20  ;;  %v2704_v50 = vld [vmem:[%s3392_s0 + $0x58] sm:$0xff]  ;;  %v2712_v51 = vld [vmem:[%s3392_s0 + $0x60] sm:$0xff]  ;;  %v2720_v52 = vld [vmem:[%s3392_s0 + $0x68] sm:$0xff] }
  0x52   :  { %2170 = vmatprep.subr.bf16.mxu0 %v2169_v21  ;;  %v2728_v53 = vld [vmem:[%s3392_s0 + $0x70] sm:$0xff]  ;;  %v479_v54 = vld [vmem:[#allocation2 + $0xc0] sm:$0xff]  ;;  %v484_v56 = vld [vmem:[#allocation2 + $0xe8] sm:$0xff] }
  0x53   :  { %v481_v55 = vld [vmem:[#allocation2 + $0xd0] sm:$0xff]  ;;  %v486_v57 = vld [vmem:[#allocation2 + $0xf8] sm:$0xff]  ;;  %v93_v58 = vld [vmem:[%s3392_s0] sm:$0xff] }
  0x54   :  { %1872 = vmatmul.mubr.msk.f32.vlgmr.msra.gmra.mrb[0].mxu0 %vm134_vm0, %v2624_v26  ;;  %v2183_v59 = vpack.c.bf16 %v481_v55, %v479_v54  ;;  %v2185_v60 = vpack.c.bf16 %v486_v57, %v484_v56  ;;  %v483_v61 = vld [vmem:[#allocation2 + $0xe0] sm:$0xff]  ;;  %v485_v62 = vld [vmem:[#allocation2 + $0xf0] sm:$0xff]  ;;  %v488_v63 = vld [vmem:[#allocation2 + $0x108] sm:$0xff] }
  0x55   :  { %2172 = vmatpush1.bf16.msra.mxu0 %v2171_v27  ;;  %247 = vmatprep.mubr.f32.mxu0 %v2514_v7  ;;  %v490_v0 = vld [vmem:[#allocation2 + $0x118] sm:$0xff]  ;;  %v2187_v1 = vpack.c.bf16 %v485_v62, %v483_v61  ;;  %v487_v3 = vld [vmem:[#allocation2 + $0x100] sm:$0xff]  ;;  %v489_v4 = vld [vmem:[#allocation2 + $0x110] sm:$0xff]  ;;  %v673_v27 = vlaneseq }
  0x56   :  { %2174 = vmatprep.subr.bf16.mxu0 %v2173_v28  ;;  %v2189_v2 = vpack.c.bf16 %v490_v0, %v488_v63  ;;  %v2191_v5 = vpack.c.bf16 %v489_v4, %v487_v3  ;;  %v108_v6 = vld [vmem:[%s3392_s0 + $0x78] sm:$0xff]  ;;  %v1914_v8 = vld [vmem:[%s3395_s3 + $0x90] sm:$0xff]  ;;  %v1916_v10 = vld [vmem:[%s3395_s3 + $0xa0] sm:$0xff] }
  0x57   :  { %v1915_v9 = vld [vmem:[%s3395_s3 + $0x98] sm:$0xff]  ;;  %v1917_v13 = vld [vmem:[%s3395_s3 + $0xa8] sm:$0xff]  ;;  %v1918_v15 = vld [vmem:[%s3395_s3 + $0xb0] sm:$0xff]  ;;  %v674_v28 = vshrl.u32 %v673_v27, 7 }
  0x58   :  { %1873 = vmatmul.mubr.msk.f32.gmra.mrb[2].mxu0 %vm134_vm0, %v2632_v33  ;;  %v2194_v12 = vpack.c.bf16 %v1915_v9, %v1914_v8  ;;  %v2197_v14 = vpack.c.bf16 %v1917_v13, %v1916_v10  ;;  %v1919_v16 = vld [vmem:[%s3395_s3 + $0xb8] sm:$0xff]  ;;  %v1920_v18 = vld [vmem:[%s3395_s3 + $0xc0] sm:$0xff]  ;;  %v1921_v19 = vld [vmem:[%s3395_s3 + $0xc8] sm:$0xff] }
  0x59   :  { %253 = vmatprep.mubr.f32.mxu0 %v2514_v7  ;;  %2176 = vmatpush1.bf16.msra.mxu0 %v2175_v34  ;;  %v2200_v17 = vpack.c.bf16 %v1919_v16, %v1918_v15  ;;  %v2203_v20 = vpack.c.bf16 %v1921_v19, %v1920_v18  ;;  %v1922_v21 = vld [vmem:[%s3395_s3 + $0xd0] sm:$0xff]  ;;  %v1923_v22 = vld [vmem:[%s3395_s3 + $0xd8] sm:$0xff]  ;;  %v1924_v24 = vld [vmem:[%s3395_s3 + $0xe0] sm:$0xff]  ;;  %v675_v29 = vsub.s32 0, %v674_v28  ;;  %v679_v31 = vsub.s32 1, %v674_v28 }
  0x5a   :  { %2178 = vmatprep.subr.bf16.mxu0 %v2177_v35  ;;  %2195 = vmatpush1.bf16.msra.mxu1 %v2194_v12  ;;  %v2206_v23 = vpack.c.bf16 %v1923_v22, %v1922_v21  ;;  %v1925_v25 = vld [vmem:[%s3395_s3 + $0xe8] sm:$0xff]  ;;  %v671_v30 = vld [vmem:[%s3394_s2] sm:$0x3]  ;;  %v1930_v9 = vld [vmem:[%s3395_s3 + $0x110] sm:$0xff] }
  0x5b   :  { %2196 = vmatprep.subr.bf16.mxu1 %v2515_v11  ;;  %v2868_v32 = vrot.slane %v671_v30, %v675_v29  ;;  %v1931_v10 = vld [vmem:[%s3395_s3 + $0x118] sm:$0xf]  ;;  %vm2915_vm11 = vmpackc.low %vm1075_vm8, %vm2516_vm10 }
  0x5c   :  { %1874 = vmatmul.mubr.msk.f32.gmra.mrb[4].mxu0 %vm134_vm0, %v2640_v40  ;;  %v2218_v16 = vpack.c.bf16 %v1931_v10, %v1930_v9 }
  0x5d   :  { %259 = vmatprep.mubr.f32.mxu0 %v2514_v7  ;;  %2180 = vmatpush1.bf16.msra.mxu0 %v2179_v41 }
  0x5e   :  { %2182 = vmatprep.subr.bf16.mxu0 %v2181_v42  ;;  %2198 = vmatpush1.bf16.msra.mxu1 %v2197_v14 }
  0x5f   :  { %2199 = vmatprep.subr.bf16.mxu1 %v2515_v11 }
  0x60   :  { %1875 = vmatmul.mubr.msk.f32.gmra.mrb[6].mxu0 %vm134_vm0, %v2648_v43 }
  0x61   :  { %265 = vmatprep.mubr.f32.mxu0 %v2514_v7 }
  0x62   :  { %2201 = vmatpush1.bf16.msra.mxu1 %v2200_v17 }
  0x63   :  { %2202 = vmatprep.subr.bf16.mxu1 %v2515_v11 }
  0x64   :  { %1876 = vmatmul.mubr.msk.f32.gmra.mrb[8].mxu0 %vm134_vm0, %v2656_v44 }
  0x65   :  { %271 = vmatprep.mubr.f32.mxu0 %v2514_v7 }
  0x66   :  { %2204 = vmatpush1.bf16.msra.mxu1 %v2203_v20  ;;  %v1424_v20 = vld [vmem:[#allocation5 + $0x50] sm:$0xff] }
  0x67   :  { %2205 = vmatprep.subr.bf16.mxu1 %v2515_v11 }
  0x68   :  { %1877 = vmatmul.mubr.msk.f32.gmra.mrb[10].mxu0 %vm134_vm0, %v2664_v45 }
  0x69   :  { %277 = vmatprep.mubr.f32.mxu0 %v2514_v7 }
  0x6a   :  { %2207 = vmatpush1.bf16.msra.mxu1 %v2206_v23 }
  0x6b   :  { %2208 = vmatprep.subr.bf16.mxu1 %v2515_v11 }
  0x6c   :  { %1878 = vmatmul.mubr.msk.f32.gmra.mrb[12].mxu0 %vm134_vm0, %v2672_v46 }
  0x6d   :  { %283 = vmatprep.mubr.f32.mxu0 %v2514_v7 }
  0x70   :  { %1879 = vmatmul.mubr.msk.f32.gmra.mrb[14].mxu0 %vm134_vm0, %v2680_v47 }
  0x71   :  { %289 = vmatprep.mubr.f32.mxu0 %v2514_v7 }
  0x74   :  { %1880 = vmatmul.mubr.msk.f32.gmra.mrb[16].mxu0 %vm134_vm0, %v2688_v48 }
  0x75   :  { %295 = vmatprep.mubr.f32.mxu0 %v2514_v7 }
  0x78   :  { %1881 = vmatmul.mubr.msk.f32.gmra.mrb[18].mxu0 %vm134_vm0, %v2696_v49 }
  0x79   :  { %301 = vmatprep.mubr.f32.mxu0 %v2514_v7 }
  0x7c   :  { %1882 = vmatmul.mubr.msk.f32.gmra.mrb[20].mxu0 %vm134_vm0, %v2704_v50 }
  0x7d   :  { %307 = vmatprep.mubr.f32.mxu0 %v2514_v7 }
  0x80   :  { %1883 = vmatmul.mubr.msk.f32.gmra.mrb[22].mxu0 %vm134_vm0, %v2712_v51 }
  0x81   :  { %313 = vmatprep.mubr.f32.mxu0 %v2514_v7 }
  0x84   :  { %1884 = vmatmul.mubr.msk.f32.gmra.mrb[24].mxu0 %vm134_vm0, %v2720_v52 }
  0x85   :  { %319 = vmatprep.mubr.f32.mxu0 %v2514_v7 }
  0x88   :  { %1885 = vmatmul.mubr.msk.f32.gmra.mrb[26].mxu0 %vm134_vm0, %v2728_v53 }
  0x89   :  { %393 = vmatprep.mubr.f32.mxu0 %v2514_v7 }
  0x8c   :  { %1886 = vmatmul.mubr.msk.f32.vlgmr.msra.gmra.mrb[0].mxu0 %vm134_vm0, %v93_v58 }
  0x8d   :  { %2184 = vmatpush1.bf16.msra.mxu0 %v2183_v59  ;;  %399 = vmatprep.mubr.f32.mxu0 %v2514_v7  ;;  %v1928_v59 = vld [vmem:[%s3395_s3 + $0x100] sm:$0xff] }
  0x8e   :  { %2186 = vmatprep.subr.bf16.mxu0 %v2185_v60  ;;  %v1929_v60 = vld [vmem:[%s3395_s3 + $0x108] sm:$0xff] }
  0x90   :  { %1887 = vmatmul.mubr.msk.f32.gmra.mrb[2].mxu0 %vm134_vm0, %v2624_v26  ;;  %v2209_v26 = vpack.c.bf16 %v1925_v25, %v1924_v24 }
  0x91   :  { %405 = vmatprep.mubr.f32.mxu0 %v2514_v7  ;;  %2188 = vmatpush1.bf16.msra.mxu0 %v2187_v1  ;;  %v2215_v1 = vpack.c.bf16 %v1929_v60, %v1928_v59 }
  0x92   :  { %2190 = vmatprep.subr.bf16.mxu0 %v2189_v2  ;;  %2210 = vmatpush1.bf16.msra.mxu1 %v2209_v26 }
  0x93   :  { %2211 = vmatprep.subr.bf16.mxu1 %v2515_v11 }
  0x94   :  { %1888 = vmatmul.mubr.msk.f32.gmra.mrb[4].mxu0 %vm134_vm0, %v2632_v33 }
  0x95   :  { %411 = vmatprep.mubr.f32.mxu0 %v2514_v7  ;;  %2192 = vmatpush1.bf16.msra.mxu0 %v2191_v5 }
  0x96   :  { %2322 = vmatprep.subr.bf16.mxu0 %v2515_v11 }
  0x98   :  { %1889 = vmatmul.mubr.msk.f32.gmra.mrb[6].mxu0 %vm134_vm0, %v2640_v40 }
  0x99   :  { %417 = vmatprep.mubr.f32.mxu0 %v2514_v7 }
  0x9c   :  { %1890 = vmatmul.mubr.msk.f32.gmra.mrb[8].mxu0 %vm134_vm0, %v2648_v43 }
  0x9d   :  { %423 = vmatprep.mubr.f32.mxu0 %v2514_v7 }
  0xa0   :  { %1891 = vmatmul.mubr.msk.f32.gmra.mrb[10].mxu0 %vm134_vm0, %v2656_v44 }
  0xa1   :  { %429 = vmatprep.mubr.f32.mxu0 %v2514_v7 }
  0xa4   :  { %1892 = vmatmul.mubr.msk.f32.gmra.mrb[12].mxu0 %vm134_vm0, %v2664_v45 }
  0xa5   :  { %435 = vmatprep.mubr.f32.mxu0 %v2514_v7 }
  0xa8   :  { %1893 = vmatmul.mubr.msk.f32.gmra.mrb[14].mxu0 %vm134_vm0, %v2672_v46 }
  0xa9   :  { %441 = vmatprep.mubr.f32.mxu0 %v2514_v7 }
  0xac   :  { %1894 = vmatmul.mubr.msk.f32.gmra.mrb[16].mxu0 %vm134_vm0, %v2680_v47 }
  0xad   :  { %447 = vmatprep.mubr.f32.mxu0 %v2514_v7 }
  0xb0   :  { %1895 = vmatmul.mubr.msk.f32.gmra.mrb[18].mxu0 %vm134_vm0, %v2688_v48 }
  0xb1   :  { %453 = vmatprep.mubr.f32.mxu0 %v2514_v7 }
  0xb4   :  { %1896 = vmatmul.mubr.msk.f32.gmra.mrb[20].mxu0 %vm134_vm0, %v2696_v49 }
  0xb5   :  { %459 = vmatprep.mubr.f32.mxu0 %v2514_v7 }
  0xb8   :  { %1897 = vmatmul.mubr.msk.f32.gmra.mrb[22].mxu0 %vm134_vm0, %v2704_v50 }
  0xb9   :  { %465 = vmatprep.mubr.f32.mxu0 %v2514_v7 }
  0xbc   :  { %1898 = vmatmul.mubr.msk.f32.gmra.mrb[24].mxu0 %vm134_vm0, %v2712_v51 }
  0xbd   :  { %471 = vmatprep.mubr.f32.mxu0 %v2514_v7 }
  0xc0   :  { %1899 = vmatmul.mubr.msk.f32.gmra.mrb[26].mxu0 %vm134_vm0, %v2720_v52 }
  0xc1   :  { %558 = vmatprep.mubr.f32.mxu0 %v2514_v7 }
  0xc4   :  { %1900 = vmatmul.mubr.msk.f32.vlgmr.msra.gmra.mrb[0].mxu0 %vm134_vm0, %v2632_v33  ;;  %v2870_v33 = vrot.slane %v671_v30, %v679_v31 }
  0xc5   :  { %564 = vmatprep.mubr.f32.mxu0 %v2514_v7 }
  0xc8   :  { %1901 = vmatmul.mubr.msk.f32.gmra.mrb[2].mxu0 %vm134_vm0, %v2640_v40 }
  0xc9   :  { %570 = vmatprep.mubr.f32.mxu0 %v2514_v7 }
  0xcc   :  { %1902 = vmatmul.mubr.msk.f32.gmra.mrb[4].mxu0 %vm134_vm0, %v2648_v43 }
  0xcd   :  { %576 = vmatprep.mubr.f32.mxu0 %v2514_v7 }
  0xd0   :  { %1903 = vmatmul.mubr.msk.f32.gmra.mrb[6].mxu0 %vm134_vm0, %v2656_v44 }
  0xd1   :  { %582 = vmatprep.mubr.f32.mxu0 %v2514_v7 }
  0xd4   :  { %1904 = vmatmul.mubr.msk.f32.gmra.mrb[8].mxu0 %vm134_vm0, %v2664_v45  ;;  %v1926_v45 = vld [vmem:[%s3395_s3 + $0xf0] sm:$0xff] }
  0xd5   :  { %588 = vmatprep.mubr.f32.mxu0 %v2514_v7 }
  0xd8   :  { %1905 = vmatmul.mubr.msk.f32.gmra.mrb[10].mxu0 %vm134_vm0, %v2672_v46  ;;  %v1927_v46 = vld [vmem:[%s3395_s3 + $0xf8] sm:$0xff] }
  0xd9   :  { %594 = vmatprep.mubr.f32.mxu0 %v2514_v7 }
  0xdc   :  { %1906 = vmatmul.mubr.msk.f32.gmra.mrb[12].mxu0 %vm134_vm0, %v2680_v47 }
  0xdd   :  { %600 = vmatprep.mubr.f32.mxu0 %v2514_v7 }
  0xe0   :  { %1907 = vmatmul.mubr.msk.f32.gmra.mrb[14].mxu0 %vm134_vm0, %v2688_v48  ;;  %v2212_v48 = vpack.c.bf16 %v1927_v46, %v1926_v45 }
  0xe1   :  { %606 = vmatprep.mubr.f32.mxu0 %v2514_v7 }
  0xe2   :  { %2213 = vmatpush1.bf16.msra.mxu1 %v2212_v48 }
  0xe3   :  { %2214 = vmatprep.subr.bf16.mxu1 %v2515_v11 }
  0xe4   :  { %1908 = vmatmul.mubr.msk.f32.gmra.mrb[16].mxu0 %vm134_vm0, %v2696_v49 }
  0xe5   :  { %612 = vmatprep.mubr.f32.mxu0 %v2514_v7 }
  0xe6   :  { %2216 = vmatpush1.bf16.msra.mxu1 %v2215_v1 }
  0xe7   :  { %2217 = vmatprep.subr.bf16.mxu1 %v2515_v11 }
  0xe8   :  { %1909 = vmatmul.mubr.msk.f32.gmra.mrb[18].mxu0 %vm134_vm0, %v2704_v50 }
  0xe9   :  { %618 = vmatprep.mubr.f32.mxu0 %v2514_v7 }
  0xea   :  { %2220 = vmatpush1.bf16.msk.msra.mxu1 %vm2915_vm11, %v2218_v16 }
  0xeb   :  { %2221 = vmatprep.subr.bf16.mxu1 %v2515_v11 }
  0xec   :  { %1910 = vmatmul.mubr.msk.f32.gmra.mrb[20].mxu0 %vm134_vm0, %v2712_v51 }
  0xed   :  { %624 = vmatprep.mubr.f32.mxu0 %v2514_v7 }
  0xf0   :  { %1911 = vmatmul.mubr.msk.f32.gmra.mrb[22].mxu0 %vm134_vm0, %v2720_v52 }
  0xf1   :  { %630 = vmatprep.mubr.f32.mxu0 %v2514_v7 }
  0xf4   :  { %1912 = vmatmul.mubr.msk.f32.gmra.mrb[24].mxu0 %vm134_vm0, %v2728_v53 }
  0xf5   :  { %636 = vmatprep.mubr.f32.mxu0 %v2514_v7 }
  0xf8   :  { %1913 = vmatmul.mubr.msk.f32.gmra.mrb[26].mxu0 %vm134_vm0, %v108_v6 }
 0x197   :  { %v560_v34 = vpop.f32.mrb[0].mxu0 }
 0x198   :  { %v683_v35 = vadd.f32 %v2868_v32, %v560_v34  ;;  %v562_v36 = vpop.f32.mrb[1].mxu0 }
 0x199   :  { %v684_v38 = vadd.f32 %v2870_v33, %v562_v36 }
 0x19a   :  { %v740_v40 = vmul.f32 %v2873_v37, %v683_v35  ;;  %vm711_vm1 = vcmp.gt.f32.partialorder %v683_v35, 0.0 }
 0x19b   :  { %v566_v39 = vpop.f32.mrb[2].mxu0  ;;  %v741_v43 = vmul.f32 %v2873_v37, %v684_v38  ;;  %vm712_vm2 = vcmp.gt.f32.partialorder %v684_v38, 0.0 }
 0x19c   :  { %v685_v41 = vadd.f32 %v2868_v32, %v566_v39  ;;  %v568_v42 = vpop.f32.mrb[3].mxu0  ;;  %v768_v51 = vsel %vm711_vm1, %v683_v35, %v740_v40 }
 0x19d   :  { %v686_v44 = vadd.f32 %v2870_v33, %v568_v42  ;;  %v769_v55 = vsel %vm712_vm2, %v684_v38, %v741_v43 }
 0x19e   :  { %vm713_vm3 = vcmp.gt.f32.partialorder %v685_v41, 0.0  ;;  %v742_v47 = vmul.f32 %v2873_v37, %v685_v41 }
 0x19f   :  { %vm714_vm4 = vcmp.gt.f32.partialorder %v686_v44, 0.0  ;;  %v743_v49 = vmul.f32 %v2873_v37, %v686_v44  ;;  %v572_v50 = vpop.f32.mrb[4].mxu0 }
 0x1a0   :  { %v770_v52 = vsel %vm713_vm3, %v685_v41, %v742_v47  ;;  %v687_v53 = vadd.f32 %v2868_v32, %v572_v50  ;;  %v574_v54 = vpop.f32.mrb[5].mxu0 }
 0x1a1   :  { %v2889_v56 = vmax.f32 %v768_v51, %v770_v52  ;;  %v771_v57 = vsel %vm714_vm4, %v686_v44, %v743_v49  ;;  %v688_v58 = vadd.f32 %v2870_v33, %v574_v54 }
 0x1a2   :  { %v2899_v61 = vmax.f32 %v769_v55, %v771_v57  ;;  %vm715_vm5 = vcmp.gt.f32.partialorder %v687_v53, 0.0  ;;  %v744_v62 = vmul.f32 %v2873_v37, %v687_v53 }
 0x1a3   :  { %vm716_vm6 = vcmp.gt.f32.partialorder %v688_v58, 0.0  ;;  %v745_v63 = vmul.f32 %v2873_v37, %v688_v58  ;;  %v578_v0 = vpop.f32.mrb[6].mxu0 }
 0x1a4   :  { %v772_v2 = vsel %vm715_vm5, %v687_v53, %v744_v62  ;;  %v689_v3 = vadd.f32 %v2868_v32, %v578_v0  ;;  %v580_v4 = vpop.f32.mrb[7].mxu0 }
 0x1a5   :  { %v798_v5 = vmax.f32 %v770_v52, %v772_v2  ;;  %v773_v6 = vsel %vm716_vm6, %v688_v58, %v745_v63  ;;  %v690_v8 = vadd.f32 %v2870_v33, %v580_v4 }
 0x1a6   :  { %v799_v12 = vmax.f32 %v771_v57, %v773_v6  ;;  %vm717_vm7 = vcmp.gt.f32.partialorder %v689_v3, 0.0  ;;  %v746_v13 = vmul.f32 %v2873_v37, %v689_v3 }
 0x1a7   :  { %vm718_vm9 = vcmp.gt.f32.partialorder %v690_v8, 0.0  ;;  %v747_v14 = vmul.f32 %v2873_v37, %v690_v8  ;;  %v584_v15 = vpop.f32.mrb[8].mxu0 }
 0x1a8   :  { %v774_v17 = vsel %vm717_vm7, %v689_v3, %v746_v13  ;;  %v691_v18 = vadd.f32 %v2868_v32, %v584_v15  ;;  %v586_v19 = vpop.f32.mrb[9].mxu0 }
 0x1a9   :  { %v2919_v21 = vmax.f32 %v798_v5, %v774_v17  ;;  %v775_v22 = vsel %vm718_vm9, %v690_v8, %v747_v14  ;;  %v692_v23 = vadd.f32 %v2870_v33, %v586_v19 }
 0x1aa   :  { %v2924_v24 = vmax.f32 %v799_v12, %v775_v22  ;;  %vm719_vm12 = vcmp.gt.f32.partialorder %v691_v18, 0.0  ;;  %v748_v25 = vmul.f32 %v2873_v37, %v691_v18 }
 0x1ab   :  { %vm720_vm13 = vcmp.gt.f32.partialorder %v692_v23, 0.0  ;;  %v749_v26 = vmul.f32 %v2873_v37, %v692_v23  ;;  %v590_v28 = vpop.f32.mrb[10].mxu0  ;;  %898 = vrot.lane.b32.xlu1 %v2919_v21, %s2517_s9  ;;  %840 = vrot.lane.b32.xlu0 %v2919_v21, %s2518_s28 }
 0x1ac   :  { %v776_v29 = vsel %vm719_vm12, %v691_v18, %v748_v25  ;;  %v693_v30 = vadd.f32 %v2868_v32, %v590_v28  ;;  %v592_v31 = vpop.f32.mrb[11].mxu0 }
 0x1ad   :  { %v802_v34 = vmax.f32 %v774_v17, %v776_v29  ;;  %v777_v35 = vsel %vm720_vm13, %v692_v23, %v749_v26  ;;  %v694_v36 = vadd.f32 %v2870_v33, %v592_v31 }
 0x1ae   :  { %v803_v38 = vmax.f32 %v775_v22, %v777_v35  ;;  %vm721_vm14 = vcmp.gt.f32.partialorder %v693_v30, 0.0  ;;  %v750_v39 = vmul.f32 %v2873_v37, %v693_v30 }
 0x1af   :  { %vm722_vm15 = vcmp.gt.f32.partialorder %v694_v36, 0.0  ;;  %v751_v40 = vmul.f32 %v2873_v37, %v694_v36  ;;  %v596_v41 = vpop.f32.mrb[12].mxu0  ;;  %900 = vrot.lane.b32.xlu1 %v2924_v24, %s2517_s9  ;;  %842 = vrot.lane.b32.xlu0 %v2924_v24, %s2518_s28 }
 0x1b0   :  { %v778_v42 = vsel %vm721_vm14, %v693_v30, %v750_v39  ;;  %v695_v43 = vadd.f32 %v2868_v32, %v596_v41  ;;  %v598_v44 = vpop.f32.mrb[13].mxu0 }
 0x1b1   :  { %v2942_v45 = vmax.f32 %v802_v34, %v778_v42  ;;  %v779_v46 = vsel %vm722_vm15, %v694_v36, %v751_v40  ;;  %v696_v47 = vadd.f32 %v2870_v33, %v598_v44 }
 0x1b2   :  { %v2945_v48 = vmax.f32 %v803_v38, %v779_v46  ;;  %vm723_vm0 = vcmp.gt.f32.partialorder %v695_v43, 0.0  ;;  %v752_v49 = vmul.f32 %v2873_v37, %v695_v43 }
 0x1b3   :  { %vm724_vm1 = vcmp.gt.f32.partialorder %v696_v47, 0.0  ;;  %v753_v50 = vmul.f32 %v2873_v37, %v696_v47  ;;  %v602_v51 = vpop.f32.mrb[14].mxu0  ;;  %844 = vrot.lane.b32.xlu1 %v2942_v45, %s2518_s28  ;;  %902 = vrot.lane.b32.xlu0 %v2942_v45, %s2517_s9 }
 0x1b4   :  { %v780_v52 = vsel %vm723_vm0, %v695_v43, %v752_v49  ;;  %v697_v53 = vadd.f32 %v2868_v32, %v602_v51  ;;  %v604_v54 = vpop.f32.mrb[15].mxu0 }
 0x1b5   :  { %v806_v55 = vmax.f32 %v778_v42, %v780_v52  ;;  %v781_v57 = vsel %vm724_vm1, %v696_v47, %v753_v50  ;;  %v698_v58 = vadd.f32 %v2870_v33, %v604_v54  ;;  %vm864_vm1 = vcmask 965632  }
 0x1b6   :  { %v807_v59 = vmax.f32 %v779_v46, %v781_v57  ;;  %vm725_vm2 = vcmp.gt.f32.partialorder %v697_v53, 0.0  ;;  %v754_v60 = vmul.f32 %v2873_v37, %v697_v53 }
 0x1b7   :  { %vm726_vm3 = vcmp.gt.f32.partialorder %v698_v58, 0.0  ;;  %v755_v62 = vmul.f32 %v2873_v37, %v698_v58  ;;  %v608_v63 = vpop.f32.mrb[16].mxu0  ;;  %904 = vrot.lane.b32.xlu1 %v2945_v48, %s2517_s9  ;;  %846 = vrot.lane.b32.xlu0 %v2945_v48, %s2518_s28 }
 0x1b8   :  { %v782_v0 = vsel %vm725_vm2, %v697_v53, %v754_v60  ;;  %v699_v1 = vadd.f32 %v2868_v32, %v608_v63  ;;  %v610_v2 = vpop.f32.mrb[17].mxu0  ;;  %vm886_vm2 = vcmask 15360  }
 0x1b9   :  { %v2962_v3 = vmax.f32 %v806_v55, %v782_v0  ;;  %v783_v4 = vsel %vm726_vm3, %v698_v58, %v755_v62  ;;  %v700_v5 = vadd.f32 %v2870_v33, %v610_v2  ;;  %vm922_vm3 = vcmask 80896  }
 0x1ba   :  { %v2965_v6 = vmax.f32 %v807_v59, %v783_v4  ;;  %vm727_vm4 = vcmp.gt.f32.partialorder %v699_v1, 0.0  ;;  %v756_v8 = vmul.f32 %v2873_v37, %v699_v1 }
 0x1bb   :  { %vm728_vm5 = vcmp.gt.f32.partialorder %v700_v5, 0.0  ;;  %v757_v9 = vmul.f32 %v2873_v37, %v700_v5  ;;  %v614_v10 = vpop.f32.mrb[18].mxu0  ;;  %848 = vrot.lane.b32.xlu1 %v2962_v3, %s2518_s28  ;;  %906 = vrot.lane.b32.xlu0 %v2962_v3, %s2517_s9 }
 0x1bc   :  { %v784_v12 = vsel %vm727_vm4, %v699_v1, %v756_v8  ;;  %v701_v13 = vadd.f32 %v2868_v32, %v614_v10  ;;  %v616_v14 = vpop.f32.mrb[19].mxu0  ;;  %vm1059_vm4 = vcmask 97280  }
 0x1bd   :  { %v810_v15 = vmax.f32 %v782_v0, %v784_v12  ;;  %v785_v16 = vsel %vm728_vm5, %v700_v5, %v757_v9  ;;  %v702_v17 = vadd.f32 %v2870_v33, %v616_v14 }
 0x1be   :  { %v811_v18 = vmax.f32 %v783_v4, %v785_v16  ;;  %vm729_vm6 = vcmp.gt.f32.partialorder %v701_v13, 0.0  ;;  %v758_v19 = vmul.f32 %v2873_v37, %v701_v13 }
 0x1bf   :  { %vm730_vm7 = vcmp.gt.f32.partialorder %v702_v17, 0.0  ;;  %v759_v22 = vmul.f32 %v2873_v37, %v702_v17  ;;  %v620_v23 = vpop.f32.mrb[20].mxu0  ;;  %908 = vrot.lane.b32.xlu1 %v2965_v6, %s2517_s9  ;;  %850 = vrot.lane.b32.xlu0 %v2965_v6, %s2518_s28 }
 0x1c0   :  { %v786_v25 = vsel %vm729_vm6, %v701_v13, %v758_v19  ;;  %v703_v26 = vadd.f32 %v2868_v32, %v620_v23  ;;  %v622_v28 = vpop.f32.mrb[21].mxu0 }
 0x1c1   :  { %v2982_v29 = vmax.f32 %v810_v15, %v786_v25  ;;  %v787_v30 = vsel %vm730_vm7, %v702_v17, %v759_v22  ;;  %v704_v31 = vadd.f32 %v2870_v33, %v622_v28 }
 0x1c2   :  { %v2985_v34 = vmax.f32 %v811_v18, %v787_v30  ;;  %vm731_vm8 = vcmp.gt.f32.partialorder %v703_v26, 0.0  ;;  %v760_v35 = vmul.f32 %v2873_v37, %v703_v26 }
 0x1c3   :  { %vm732_vm9 = vcmp.gt.f32.partialorder %v704_v31, 0.0  ;;  %v761_v36 = vmul.f32 %v2873_v37, %v704_v31  ;;  %v626_v38 = vpop.f32.mrb[22].mxu0  ;;  %852 = vrot.lane.b32.xlu1 %v2982_v29, %s2518_s28  ;;  %910 = vrot.lane.b32.xlu0 %v2982_v29, %s2517_s9 }
 0x1c4   :  { %v788_v39 = vsel %vm731_vm8, %v703_v26, %v760_v35  ;;  %v705_v40 = vadd.f32 %v2868_v32, %v626_v38  ;;  %v628_v41 = vpop.f32.mrb[23].mxu0  ;;  %v3049_v26 = vstv %s1869_s16  ;;  %v1023_v38 = vld [vmem:[%s3395_s3 + $0x8] sm:$0xff] }
 0x1c5   :  { %v814_v42 = vmax.f32 %v786_v25, %v788_v39  ;;  %v789_v43 = vsel %vm732_vm9, %v704_v31, %v761_v36  ;;  %v706_v44 = vadd.f32 %v2870_v33, %v628_v41  ;;  %v1022_v36 = vld [vmem:[%s3395_s3] sm:$0xff] }
 0x1c6   :  { %v815_v46 = vmax.f32 %v787_v30, %v789_v43  ;;  %vm733_vm10 = vcmp.gt.f32.partialorder %v705_v40, 0.0  ;;  %v762_v47 = vmul.f32 %v2873_v37, %v705_v40  ;;  %v2222_v39 = vpack.c.bf16 %v1023_v38, %v1022_v36 }
 0x1c7   :  { %vm734_vm12 = vcmp.gt.f32.partialorder %v706_v44, 0.0  ;;  %v763_v49 = vmul.f32 %v2873_v37, %v706_v44  ;;  %v632_v50 = vpop.f32.mrb[24].mxu0  ;;  %912 = vrot.lane.b32.xlu1 %v2985_v34, %s2517_s9  ;;  %854 = vrot.lane.b32.xlu0 %v2985_v34, %s2518_s28 }
 0x1c8   :  { %v790_v51 = vsel %vm733_vm10, %v705_v40, %v762_v47  ;;  %v707_v52 = vadd.f32 %v2868_v32, %v632_v50  ;;  %v634_v53 = vpop.f32.mrb[25].mxu0 }
 0x1c9   :  { %v3002_v54 = vmax.f32 %v814_v42, %v790_v51  ;;  %v791_v55 = vsel %vm734_vm12, %v706_v44, %v763_v49  ;;  %v708_v57 = vadd.f32 %v2870_v33, %v634_v53  ;;  %v1024_v44 = vld [vmem:[%s3395_s3 + $0x10] sm:$0xff] }
 0x1ca   :  { %v3005_v58 = vmax.f32 %v815_v46, %v791_v55  ;;  %vm735_vm13 = vcmp.gt.f32.partialorder %v707_v52, 0.0  ;;  %v764_v59 = vmul.f32 %v2873_v37, %v707_v52  ;;  %v1025_v46 = vld [vmem:[%s3395_s3 + $0x18] sm:$0xff] }
 0x1cb   :  { %vm736_vm14 = vcmp.gt.f32.partialorder %v708_v57, 0.0  ;;  %v765_v60 = vmul.f32 %v2873_v37, %v708_v57  ;;  %v638_v62 = vpop.f32.mrb[26].mxu0  ;;  %856 = vrot.lane.b32.xlu1 %v3002_v54, %s2518_s28  ;;  %914 = vrot.lane.b32.xlu0 %v3002_v54, %s2517_s9 }
 0x1cc   :  { %v792_v63 = vsel %vm735_vm13, %v707_v52, %v764_v59  ;;  %v709_v0 = vadd.f32 %v2868_v32, %v638_v62  ;;  %v640_v1 = vpop.f32.mrb[27].mxu0 }
 0x1cd   :  { %v818_v2 = vmax.f32 %v790_v51, %v792_v63  ;;  %v793_v4 = vsel %vm736_vm14, %v708_v57, %v765_v60  ;;  %v710_v5 = vadd.f32 %v2870_v33, %v640_v1  ;;  %v1026_v63 = vld [vmem:[%s3395_s3 + $0x20] sm:$0xff] }
 0x1ce   :  { %v819_v8 = vmax.f32 %v791_v55, %v793_v4  ;;  %vm737_vm15 = vcmp.gt.f32.partialorder %v709_v0, 0.0  ;;  %v766_v9 = vmul.f32 %v2873_v37, %v709_v0  ;;  %v2225_v55 = vpack.c.bf16 %v1025_v46, %v1024_v44 }
 0x1cf   :  { %vm738_vm0 = vcmp.gt.f32.partialorder %v710_v5, 0.0  ;;  %v767_v10 = vmul.f32 %v2873_v37, %v710_v5  ;;  %858 = vrot.lane.b32.xlu0 %v3005_v58, %s2518_s28  ;;  %836 = vrot.lane.b32.xlu1 %v2889_v56, %s2518_s28 }
 0x1d0   :  { %v794_v12 = vsel %vm737_vm15, %v709_v0, %v766_v9  ;;  %v1028_v9 = vld [vmem:[%s3395_s3 + $0x30] sm:$0xff] }
 0x1d1   :  { %v3021_v32 = vmax.f32 %v818_v2, %v794_v12  ;;  %v795_v13 = vsel %vm738_vm0, %v710_v5, %v767_v10  ;;  %v1029_v10 = vld [vmem:[%s3395_s3 + $0x38] sm:$0xff] }
 0x1d2   :  { %v3023_v14 = vmax.f32 %v819_v8, %v795_v13 }
 0x1d3   :  { %838 = vrot.lane.b32.xlu0 %v2899_v61, %s2518_s28  ;;  %916 = vrot.lane.b32.xlu1 %v3005_v58, %s2517_s9 }
 0x1d7   :  { %894 = vrot.lane.b32.xlu0 %v2889_v56, %s2517_s9  ;;  %896 = vrot.lane.b32.xlu1 %v2899_v61, %s2517_s9 }
 0x1db   :  { %862 = vrot.lane.b32.xlu0 %v3023_v14, %s2518_s28  ;;  %860 = vrot.lane.b32.xlu1 %v3021_v32, %s2518_s28 }
 0x1df   :  { %918 = vrot.lane.b32.xlu0 %v3021_v32, %s2517_s9  ;;  %920 = vrot.lane.b32.xlu1 %v3023_v14, %s2517_s9 }
 0x21d   :  { %v899_v33 = vpop.permute.xlu1 %898  ;;  %v841_v37 = vpop.permute.xlu0 %840 }
 0x21e   :  { %v945_v23 = vsel %vm922_vm3, %v2919_v21, %v899_v33 }
 0x221   :  { %v901_v15 = vpop.permute.xlu1 %900  ;;  %v843_v16 = vpop.permute.xlu0 %842 }
 0x222   :  { %v866_v17 = vsel %vm864_vm1, %v841_v37, %v843_v16  ;;  %v888_v18 = vsel %vm886_vm2, %v843_v16, %v2924_v24  ;;  %v924_v25 = vsel %vm922_vm3, %v899_v33, %v901_v15 }
 0x223   :  { %v953_v19 = vmax.f32 %v2919_v21, %v866_v17  ;;  %v954_v22 = vmax.f32 %v2924_v24, %v888_v18  ;;  %v2231_v17 = vpack.c.bf16 %v1029_v10, %v1028_v9 }
 0x225   :  { %v967_v28 = vmax.f32 %v953_v19, %v945_v23  ;;  %v968_v30 = vmax.f32 %v954_v22, %v924_v25  ;;  %v845_v31 = vpop.permute.xlu1 %844  ;;  %v903_v35 = vpop.permute.xlu0 %902  ;;  %v1030_v25 = vld [vmem:[%s3395_s3 + $0x40] sm:$0xff] }
 0x226   :  { %v946_v52 = vsel %vm922_vm3, %v2942_v45, %v903_v35 }
 0x227   :  { %vm982_vm5 = vcmp.gt.f32.partialorder %v968_v30, 0.0  ;;  %v997_v21 = vmul.f32 %v3049_v26, %v968_v30  ;;  %vm981_vm6 = vcmp.gt.f32.partialorder %v967_v28, 0.0  ;;  %v996_v24 = vmul.f32 %v3049_v26, %v967_v28 }
 0x229   :  { %v905_v40 = vpop.permute.xlu1 %904  ;;  %v847_v41 = vpop.permute.xlu0 %846  ;;  %v3059_v42 = vsel %vm982_vm5, %v968_v30, %v997_v21  ;;  %v3061_v43 = vsel %vm981_vm6, %v967_v28, %v996_v24  ;;  %v1032_v21 = vld [vmem:[%s3395_s3 + $0x50] sm:$0xff]  ;;  %v1033_v24 = vld [vmem:[%s3395_s3 + $0x58] sm:$0xff] }
 0x22a   :  { %v867_v47 = vsel %vm864_vm1, %v845_v31, %v847_v41  ;;  %v889_v49 = vsel %vm886_vm2, %v847_v41, %v2945_v48  ;;  %1933 = vmatprep.mubr.msk.f32.mxu1 %vm1059_vm4, %v3059_v42  ;;  %v925_v53 = vsel %vm922_vm3, %v903_v35, %v905_v40 }
 0x22b   :  { %v955_v50 = vmax.f32 %v2942_v45, %v867_v47  ;;  %v956_v51 = vmax.f32 %v2945_v48, %v889_v49  ;;  %1144 = vmatmul.mubr.f32.vlgmr.msra.gmra.mrb[0].mxu1 %v3061_v43  ;;  %v1027_v48 = vld [vmem:[%s3395_s3 + $0x28] sm:$0xff]  ;;  %v2237_v49 = vpack.c.bf16 %v1033_v24, %v1032_v21 }
 0x22c   :  { %2223 = vmatpush1.bf16.msra.mxu1 %v2222_v39  ;;  %v2228_v1 = vpack.c.bf16 %v1027_v48, %v1026_v63 }
 0x22d   :  { %v969_v57 = vmax.f32 %v955_v50, %v946_v52  ;;  %v970_v59 = vmax.f32 %v956_v51, %v925_v53  ;;  %v849_v60 = vpop.permute.xlu1 %848  ;;  %v907_v62 = vpop.permute.xlu0 %906  ;;  %2224 = vmatprep.subr.bf16.mxu1 %v2515_v11 }
 0x22e   :  { %v947_v15 = vsel %vm922_vm3, %v2962_v3, %v907_v62 }
 0x22f   :  { %vm984_vm7 = vcmp.gt.f32.partialorder %v970_v59, 0.0  ;;  %v999_v45 = vmul.f32 %v3049_v26, %v970_v59  ;;  %vm983_vm8 = vcmp.gt.f32.partialorder %v969_v57, 0.0  ;;  %v998_v0 = vmul.f32 %v3049_v26, %v969_v57 }
 0x230   :  { %2226 = vmatpush1.bf16.msra.mxu1 %v2225_v55  ;;  %v1034_v55 = vld [vmem:[%s3395_s3 + $0x60] sm:$0xff] }
 0x231   :  { %v909_v2 = vpop.permute.xlu1 %908  ;;  %v851_v4 = vpop.permute.xlu0 %850  ;;  %v3089_v5 = vsel %vm984_vm7, %v970_v59, %v999_v45  ;;  %v3091_v8 = vsel %vm983_vm8, %v969_v57, %v998_v0  ;;  %2227 = vmatprep.subr.bf16.mxu1 %v2515_v11  ;;  %v1036_v45 = vld [vmem:[%s3395_s3 + $0x70] sm:$0xff]  ;;  %v1037_v0 = vld [vmem:[%s3395_s3 + $0x78] sm:$0xff] }
 0x232   :  { %v868_v12 = vsel %vm864_vm1, %v849_v60, %v851_v4  ;;  %v890_v13 = vsel %vm886_vm2, %v851_v4, %v2965_v6  ;;  %1934 = vmatprep.mubr.msk.f32.mxu1 %vm1059_vm4, %v3089_v5  ;;  %v926_v16 = vsel %vm922_vm3, %v907_v62, %v909_v2  ;;  %v2243_v10 = vpack.c.bf16 %v1037_v0, %v1036_v45 }
 0x233   :  { %v957_v33 = vmax.f32 %v2962_v3, %v868_v12  ;;  %v958_v37 = vmax.f32 %v2965_v6, %v890_v13  ;;  %1149 = vmatmul.mubr.f32.gmra.mrb[2].mxu1 %v3091_v8  ;;  %v1031_v6 = vld [vmem:[%s3395_s3 + $0x48] sm:$0xff] }
 0x234   :  { %2229 = vmatpush1.bf16.msra.mxu1 %v2228_v1  ;;  %v2234_v30 = vpack.c.bf16 %v1031_v6, %v1030_v25 }
 0x235   :  { %v971_v18 = vmax.f32 %v957_v33, %v947_v15  ;;  %v972_v19 = vmax.f32 %v958_v37, %v926_v16  ;;  %v853_v22 = vpop.permute.xlu1 %852  ;;  %v911_v23 = vpop.permute.xlu0 %910  ;;  %2230 = vmatprep.subr.bf16.mxu1 %v2515_v11  ;;  %v1038_v15 = vld [vmem:[%s3395_s3 + $0x80] sm:$0xff]  ;;  %v1039_v16 = vld [vmem:[%s3395_s3 + $0x88] sm:$0xf] }
 0x236   :  { %v948_v46 = vsel %vm922_vm3, %v2982_v29, %v911_v23 }
 0x237   :  { %vm986_vm9 = vcmp.gt.f32.partialorder %v972_v19, 0.0  ;;  %v1001_v3 = vmul.f32 %v3049_v26, %v972_v19  ;;  %vm985_vm10 = vcmp.gt.f32.partialorder %v971_v18, 0.0  ;;  %v1000_v28 = vmul.f32 %v3049_v26, %v971_v18 }
 0x238   :  { %2232 = vmatpush1.bf16.msra.mxu1 %v2231_v17 }
 0x239   :  { %v913_v31 = vpop.permute.xlu1 %912  ;;  %v855_v35 = vpop.permute.xlu0 %854  ;;  %v3120_v36 = vsel %vm986_vm9, %v972_v19, %v1001_v3  ;;  %v3122_v38 = vsel %vm985_vm10, %v971_v18, %v1000_v28  ;;  %2233 = vmatprep.subr.bf16.mxu1 %v2515_v11 }
 0x23a   :  { %v869_v39 = vsel %vm864_vm1, %v853_v22, %v855_v35  ;;  %v891_v40 = vsel %vm886_vm2, %v855_v35, %v2985_v34  ;;  %1935 = vmatprep.mubr.msk.f32.mxu1 %vm1059_vm4, %v3120_v36  ;;  %v927_v47 = vsel %vm922_vm3, %v911_v23, %v913_v31  ;;  %v2246_v22 = vpack.c.bf16 %v1039_v16, %v1038_v15  ;;  %v1954_v15 = vld [vmem:[%s3395_s3 + $0x170] sm:$0xff]  ;;  %v1955_v16 = vld [vmem:[%s3395_s3 + $0x178] sm:$0xff] }
 0x23b   :  { %v959_v41 = vmax.f32 %v2982_v29, %v869_v39  ;;  %v960_v44 = vmax.f32 %v2985_v34, %v891_v40  ;;  %1154 = vmatmul.mubr.f32.gmra.mrb[4].mxu1 %v3122_v38  ;;  %v1035_v34 = vld [vmem:[%s3395_s3 + $0x68] sm:$0xff] }
 0x23c   :  { %2235 = vmatpush1.bf16.msra.mxu1 %v2234_v30  ;;  %v2240_v59 = vpack.c.bf16 %v1035_v34, %v1034_v55  ;;  %v1945_v39 = vld [vmem:[%s3395_s3 + $0x128] sm:$0xff]  ;;  %v1947_v55 = vld [vmem:[%s3395_s3 + $0x138] sm:$0xff] }
 0x23d   :  { %v973_v50 = vmax.f32 %v959_v41, %v948_v46  ;;  %v974_v51 = vmax.f32 %v960_v44, %v927_v47  ;;  %v857_v52 = vpop.permute.xlu1 %856  ;;  %v915_v53 = vpop.permute.xlu0 %914  ;;  %2236 = vmatprep.subr.bf16.mxu1 %v2515_v11 }
 0x23e   :  { %v949_v9 = vsel %vm922_vm3, %v3002_v54, %v915_v53 }
 0x23f   :  { %vm988_vm12 = vcmp.gt.f32.partialorder %v974_v51, 0.0  ;;  %v1003_v29 = vmul.f32 %v3049_v26, %v974_v51  ;;  %vm987_vm13 = vcmp.gt.f32.partialorder %v973_v50, 0.0  ;;  %v1002_v57 = vmul.f32 %v3049_v26, %v973_v50 }
 0x240   :  { %2238 = vmatpush1.bf16.msra.mxu1 %v2237_v49 }
 0x241   :  { %v859_v60 = vpop.permute.xlu0 %858  ;;  %v837_v62 = vpop.permute.xlu1 %836  ;;  %v3151_v63 = vsel %vm988_vm12, %v974_v51, %v1003_v29  ;;  %v3153_v48 = vsel %vm987_vm13, %v973_v50, %v1002_v57  ;;  %2239 = vmatprep.subr.bf16.mxu1 %v2515_v11  ;;  %vm1743_vm12 = vcmask 785408  }
 0x242   :  { %v870_v1 = vsel %vm864_vm1, %v857_v52, %v859_v60  ;;  %v892_v2 = vsel %vm886_vm2, %v859_v60, %v3005_v58  ;;  %1936 = vmatprep.mubr.msk.f32.mxu1 %vm1059_vm4, %v3151_v63 }
 0x243   :  { %v961_v4 = vmax.f32 %v3002_v54, %v870_v1  ;;  %1159 = vmatmul.mubr.f32.gmra.mrb[6].mxu1 %v3153_v48  ;;  %v962_v12 = vmax.f32 %v3005_v58, %v892_v2  ;;  %v1949_v2 = vld [vmem:[%s3395_s3 + $0x148] sm:$0xff] }
 0x244   :  { %2241 = vmatpush1.bf16.msra.mxu1 %v2240_v59 }
 0x245   :  { %v975_v13 = vmax.f32 %v961_v4, %v949_v9  ;;  %v839_v33 = vpop.permute.xlu0 %838  ;;  %v917_v37 = vpop.permute.xlu1 %916  ;;  %2242 = vmatprep.subr.bf16.mxu1 %v2515_v11  ;;  %v1950_v9 = vld [vmem:[%s3395_s3 + $0x150] sm:$0xff] }
 0x246   :  { %v865_v17 = vsel %vm864_vm1, %v837_v62, %v839_v33  ;;  %v887_v54 = vsel %vm886_vm2, %v839_v33, %v2899_v61  ;;  %v928_v58 = vsel %vm922_vm3, %v915_v53, %v917_v37  ;;  %v1946_v53 = vld [vmem:[%s3395_s3 + $0x130] sm:$0xff]  ;;  %v1953_v33 = vld [vmem:[%s3395_s3 + $0x168] sm:$0xff] }
 0x247   :  { %v976_v18 = vmax.f32 %v962_v12, %v928_v58  ;;  %v951_v19 = vmax.f32 %v2889_v56, %v865_v17  ;;  %v1004_v23 = vmul.f32 %v3049_v26, %v975_v13  ;;  %v952_v25 = vmax.f32 %v2899_v61, %v887_v54  ;;  %v1944_v61 = vld [vmem:[%s3395_s3 + $0x120] sm:$0xff]  ;;  %v1957_v58 = vld [vmem:[%s3395_s3 + $0x188] sm:$0xff] }
 0x248   :  { %2244 = vmatpush1.bf16.msra.mxu1 %v2243_v10  ;;  %vm989_vm15 = vcmp.gt.f32.partialorder %v975_v13, 0.0  ;;  %v2250_v50 = vpack.c.bf16 %v1945_v39, %v1944_v61  ;;  %v2253_v45 = vpack.c.bf16 %v1947_v55, %v1946_v53  ;;  %v1951_v10 = vld [vmem:[%s3395_s3 + $0x158] sm:$0xff]  ;;  %v2265_v17 = vpack.c.bf16 %v1955_v16, %v1954_v15  ;;  %v1956_v54 = vld [vmem:[%s3395_s3 + $0x180] sm:$0xff]  ;;  %v1414_v16 = vld [vmem:[#allocation5 + $0x8] sm:$0xff] }
 0x249   :  { %v1005_v6 = vmul.f32 %v3049_v26, %v976_v18  ;;  %v895_v3 = vpop.permute.xlu0 %894  ;;  %v897_v28 = vpop.permute.xlu1 %896  ;;  %vm990_vm14 = vcmp.gt.f32.partialorder %v976_v18, 0.0  ;;  %2245 = vmatprep.subr.bf16.mxu1 %v2515_v11  ;;  %v1433_v61 = vld [vmem:[#allocation5 + $0x98] sm:$0xff]  ;;  %v1413_v15 = vld [vmem:[#allocation5] sm:$0xff] }
 0x24a   :  { %v944_v30 = vsel %vm922_vm3, %v2889_v56, %v895_v3  ;;  %v923_v31 = vsel %vm922_vm3, %v895_v3, %v897_v28  ;;  %v3203_v56 = vsel %vm989_vm15, %v975_v13, %v1004_v23  ;;  %v1952_v13 = vld [vmem:[%s3395_s3 + $0x160] sm:$0xff] }
 0x24b   :  { %v965_v35 = vmax.f32 %v951_v19, %v944_v30  ;;  %v966_v21 = vmax.f32 %v952_v25, %v923_v31  ;;  %v3191_v24 = vsel %vm990_vm14, %v976_v18, %v1005_v6  ;;  %v2262_v37 = vpack.c.bf16 %v1953_v33, %v1952_v13  ;;  %v1958_v19 = vld [vmem:[%s3395_s3 + $0x190] sm:$0xff]  ;;  %v1960_v23 = vld [vmem:[%s3395_s3 + $0x1a0] sm:$0xff]  ;;  %v1961_v25 = vld [vmem:[%s3395_s3 + $0x1a8] sm:$0xf] }
 0x24c   :  { %1937 = vmatprep.mubr.msk.f32.mxu1 %vm1059_vm4, %v3191_v24  ;;  %2248 = vmatpush1.bf16.msk.msra.mxu1 %vm2915_vm11, %v2246_v22  ;;  %v2268_v18 = vpack.c.bf16 %v1957_v58, %v1956_v54  ;;  %v2274_v6 = vpack.c.bf16 %v1961_v25, %v1960_v23  ;;  %v1426_v3 = vld [vmem:[#allocation5 + $0x60] sm:$0xff]  ;;  %v1415_v25 = vld [vmem:[#allocation5 + $0x10] sm:$0xff] }
 0x24d   :  { %vm979_vm0 = vcmp.gt.f32.partialorder %v965_v35, 0.0  ;;  %v994_v40 = vmul.f32 %v3049_v26, %v965_v35  ;;  %v995_v41 = vmul.f32 %v3049_v26, %v966_v21  ;;  %v863_v44 = vpop.permute.xlu0 %862  ;;  %1164 = vmatmul.mubr.f32.gmra.mrb[8].mxu1 %v3203_v56  ;;  %v861_v46 = vpop.permute.xlu1 %860  ;;  %vm980_vm5 = vcmp.gt.f32.partialorder %v966_v21, 0.0  ;;  %2249 = vmatprep.subr.bf16.mxu1 %v2515_v11  ;;  %v1430_v31 = vld [vmem:[#allocation5 + $0x80] sm:$0xff] }
 0x24e   :  { %v893_v47 = vsel %vm886_vm2, %v863_v44, %v3023_v14  ;;  %v871_v49 = vsel %vm864_vm1, %v861_v46, %v863_v44  ;;  %v1725_v44 = vld [vmem:[#allocation7 + $0x8] sm:$0xff] }
 0x24f   :  { %v1009_v51 = vsel %vm980_vm5, %v966_v21, %v995_v41  ;;  %v1008_v52 = vsel %vm979_vm0, %v965_v35, %v994_v40  ;;  %v964_v34 = vmax.f32 %v3023_v14, %v893_v47  ;;  %v963_v29 = vmax.f32 %v3021_v32, %v871_v49  ;;  %v1948_v14 = vld [vmem:[%s3395_s3 + $0x140] sm:$0xff]  ;;  %v1431_v35 = vld [vmem:[#allocation5 + $0x88] sm:$0xff]  ;;  %v1724_v41 = vld [vmem:[#allocation7] sm:$0xff] }
 0x250   :  { %1939 = vmatprep.mubr.msk.f32.mxu1 %vm1059_vm4, %v1009_v51  ;;  %v2256_v4 = vpack.c.bf16 %v1949_v2, %v1948_v14  ;;  %v2287_v21 = vpack.c.bf16 %v1431_v35, %v1430_v31  ;;  %v2323_v46 = vpack.c.bf16 %v1725_v44, %v1724_v41  ;;  %v1420_v41 = vld [vmem:[#allocation5 + $0x38] sm:$0xff] }
 0x251   :  { %v919_v57 = vpop.permute.xlu0 %918  ;;  %1240 = vmatmul.mubr.f32.vlgmr.msra.gmra.mrb[10].mxu1 %v1008_v52  ;;  %v921_v59 = vpop.permute.xlu1 %920 }
 0x252   :  { %v950_v60 = vsel %vm922_vm3, %v3021_v32, %v919_v57  ;;  %2251 = vmatpush1.bf16.msra.mxu1 %v2250_v50  ;;  %v929_v62 = vsel %vm922_vm3, %v919_v57, %v921_v59  ;;  %1940 = vmatprep.mubr.msk.f32.mxu1 %vm1059_vm4, %v3059_v42 }
 0x253   :  { %v977_v0 = vmax.f32 %v963_v29, %v950_v60  ;;  %v978_v1 = vmax.f32 %v964_v34, %v929_v62  ;;  %2252 = vmatprep.subr.bf16.mxu1 %v2515_v11  ;;  %2324 = vmatpush3.bf16.msra.mxu0 %v2323_v46 }
 0x254   :  { %2325 = vmatprep.subr.bf16.mxu0 %v2515_v11 }
 0x255   :  { %v1007_v32 = vmul.f32 %v3049_v26, %v978_v1  ;;  %1245 = vmatmul.mubr.f32.gmra.mrb[12].mxu1 %v3061_v43  ;;  %vm992_vm1 = vcmp.gt.f32.partialorder %v978_v1, 0.0  ;;  %vm991_vm2 = vcmp.gt.f32.partialorder %v977_v0, 0.0  ;;  %v1006_v42 = vmul.f32 %v3049_v26, %v977_v0 }
 0x256   :  { %2254 = vmatpush1.bf16.msra.mxu1 %v2253_v45  ;;  %1941 = vmatprep.mubr.msk.f32.mxu1 %vm1059_vm4, %v3089_v5  ;;  %v2259_v26 = vpack.c.bf16 %v1951_v10, %v1950_v9 }
 0x257   :  { %2255 = vmatprep.subr.bf16.mxu1 %v2515_v11  ;;  %v1021_v43 = vsel %vm992_vm1, %v978_v1, %v1007_v32  ;;  %v1020_v12 = vsel %vm991_vm2, %v977_v0, %v1006_v42 }
 0x259   :  { %1250 = vmatmul.mubr.f32.gmra.mrb[14].mxu1 %v3091_v8 }
 0x25a   :  { %2257 = vmatpush1.bf16.msra.mxu1 %v2256_v4  ;;  %1942 = vmatprep.mubr.msk.f32.mxu1 %vm1059_vm4, %v3120_v36 }
 0x25b   :  { %2258 = vmatprep.subr.bf16.mxu1 %v2515_v11 }
 0x25d   :  { %1255 = vmatmul.mubr.f32.gmra.mrb[16].mxu1 %v3122_v38 }
 0x25e   :  { %2260 = vmatpush1.bf16.msra.mxu1 %v2259_v26  ;;  %1943 = vmatprep.mubr.msk.f32.mxu1 %vm1059_vm4, %v3151_v63 }
 0x25f   :  { %2261 = vmatprep.subr.bf16.mxu1 %v2515_v11 }
 0x261   :  { %1260 = vmatmul.mubr.f32.gmra.mrb[18].mxu1 %v3153_v48 }
 0x262   :  { %2263 = vmatpush1.bf16.msra.mxu1 %v2262_v37  ;;  %1963 = vmatprep.mubr.msk.f32.mxu1 %vm1059_vm4, %v3089_v5  ;;  %v1959_v5 = vld [vmem:[%s3395_s3 + $0x198] sm:$0xff]  ;;  %s1870_s3 = sld [smem:[#allocation8 + $0x2]] }
 0x263   :  { %2264 = vmatprep.subr.bf16.mxu1 %v2515_v11  ;;  %v2271_v22 = vpack.c.bf16 %v1959_v5, %v1958_v19  ;;  %v2293_v19 = vpack.c.bf16 %v1414_v16, %v1413_v15  ;;  %v1730_v16 = vld [vmem:[#allocation7 + $0x30] sm:$0xff] }
 0x266   :  { %2266 = vmatpush1.bf16.msra.mxu1 %v2265_v17  ;;  %v3317_v17 = vld [vmem:[%s3396_s4] ss:$0 sm:$0xff]  ;;  %s1871_s4 = sld [smem:[#allocation8 + $0x3]] }
 0x267   :  { %2267 = vmatprep.subr.bf16.mxu1 %v2515_v11 }
 0x268   :  { %v3320_v58 = vstv %s1870_s3 }
 0x26a   :  { %2269 = vmatpush1.bf16.msra.mxu1 %v2268_v18 }
 0x26b   :  { %2270 = vmatprep.subr.bf16.mxu1 %v2515_v11 }
 0x26e   :  { %2272 = vmatpush1.bf16.msra.mxu1 %v2271_v22 }
 0x26f   :  { %2273 = vmatprep.subr.bf16.mxu1 %v2515_v11 }
 0x272   :  { %2276 = vmatpush1.bf16.msk.msra.mxu1 %vm2915_vm11, %v2274_v6  ;;  %vm2519_vm11 = vmmov 0   ;;  %v1416_v6 = vld [vmem:[#allocation5 + $0x18] sm:$0xff] }
 0x273   :  { %2277 = vmatprep.subr.bf16.mxu1 %v2515_v11  ;;  %2148 = vmatprep.mubr.msk.f32.mxu0 %vm2519_vm11, %v2514_v7 }
 0x275   :  { %1355 = vmatmul.mubr.f32.vlgmr.msra.gmra.mrb[20].mxu1 %v3091_v8  ;;  %v1425_v8 = vld [vmem:[#allocation5 + $0x58] sm:$0xff] }
 0x276   :  { %1964 = vmatprep.mubr.msk.f32.mxu1 %vm1059_vm4, %v3120_v36  ;;  %v2278_v28 = vpack.c.bf16 %v1425_v8, %v1424_v20  ;;  %v1427_v36 = vld [vmem:[#allocation5 + $0x68] sm:$0xff] }
 0x278   :  { %2279 = vmatpush3.bf16.msra.mxu1 %v2278_v28 }
 0x279   :  { %1360 = vmatmul.mubr.f32.gmra.mrb[22].mxu1 %v3122_v38  ;;  %v2281_v38 = vpack.c.bf16 %v1427_v36, %v1426_v3  ;;  %2280 = vmatprep.subr.bf16.mxu1 %v2515_v11 }
 0x27a   :  { %1965 = vmatprep.mubr.msk.f32.mxu1 %vm1059_vm4, %v3151_v63  ;;  %v1428_v63 = vld [vmem:[#allocation5 + $0x70] sm:$0xff] }
 0x27c   :  { %2282 = vmatpush3.bf16.msra.mxu1 %v2281_v38 }
 0x27d   :  { %1365 = vmatmul.mubr.f32.gmra.mrb[24].mxu1 %v3153_v48  ;;  %2283 = vmatprep.subr.bf16.mxu1 %v2515_v11  ;;  %v1429_v48 = vld [vmem:[#allocation5 + $0x78] sm:$0xff] }
 0x27e   :  { %1966 = vmatprep.mubr.msk.f32.mxu1 %vm1059_vm4, %v3191_v24  ;;  %v2284_v30 = vpack.c.bf16 %v1429_v48, %v1428_v63  ;;  %v1432_v24 = vld [vmem:[#allocation5 + $0x90] sm:$0xff]  ;;  %v2296_v63 = vpack.c.bf16 %v1416_v6, %v1415_v25  ;;  %v1417_v48 = vld [vmem:[#allocation5 + $0x20] sm:$0xff] }
 0x27f   :  { %v2290_v39 = vpack.c.bf16 %v1433_v61, %v1432_v24 }
 0x280   :  { %2285 = vmatpush3.bf16.msra.mxu1 %v2284_v30  ;;  %v1418_v30 = vld [vmem:[#allocation5 + $0x28] sm:$0xff] }
 0x281   :  { %1370 = vmatmul.mubr.f32.gmra.mrb[26].mxu1 %v3203_v56  ;;  %2286 = vmatprep.subr.bf16.mxu1 %v2515_v11 }
 0x282   :  { %1967 = vmatprep.mubr.msk.f32.mxu1 %vm1059_vm4, %v1021_v43  ;;  %vm1434_vm4 = vcmask 654336  }
 0x284   :  { %2288 = vmatpush3.bf16.msra.mxu1 %v2287_v21 }
 0x285   :  { %1375 = vmatmul.mubr.f32.gmra.mrb[28].mxu1 %v1020_v12  ;;  %2289 = vmatprep.subr.bf16.mxu1 %v2515_v11 }
 0x286   :  { %2057 = vmatprep.mubr.msk.f32.mxu1 %vm2519_vm11, %v2514_v7 }
 0x288   :  { %2291 = vmatpush3.bf16.msra.mxu1 %v2290_v39 }
 0x289   :  { %2292 = vmatprep.subr.bf16.mxu1 %v2515_v11 }
 0x2fe   :  { %v1145_v56 = vpop.f32.mrb[0].mxu1 }
 0x2ff   :  { %v1147_v40 = vpop.f32.mrb[1].mxu1 }
 0x300   :  { %v1419_v40 = vld [vmem:[#allocation5 + $0x30] sm:$0xff] }
 0x301   :  { %v2302_v46 = vpack.c.bf16 %v1420_v41, %v1419_v40  ;;  %v1717_v40 = vstv %s1871_s4 }
 0x306   :  { %v1150_v47 = vpop.f32.mrb[2].mxu1 }
 0x307   :  { %v1152_v49 = vpop.f32.mrb[3].mxu1 }
 0x308   :  { %v1422_v49 = vld [vmem:[#allocation5 + $0x48] sm:$0xff] }
 0x30e   :  { %v1155_v50 = vpop.f32.mrb[4].mxu1 }
 0x30f   :  { %v1157_v51 = vpop.f32.mrb[5].mxu1 }
 0x316   :  { %v1160_v52 = vpop.f32.mrb[6].mxu1 }
 0x317   :  { %v1162_v53 = vpop.f32.mrb[7].mxu1 }
 0x318   :  { %v1609_v53 = vld [vmem:[#allocation5 + $0xa8] sm:$0xff] }
 0x320   :  { %v1165_v55 = vpop.f32.mrb[8].mxu1 }
 0x321   :  { %v1167_v34 = vpop.f32.mrb[9].mxu1 }
 0x324   :  { %v1241_v29 = vpop.f32.mrb[10].mxu1 }
 0x325   :  { %v1242_v57 = vadd.f32 %v1241_v29, %v1145_v56  ;;  %v1243_v59 = vpop.f32.mrb[11].mxu1  ;;  %v2299_v56 = vpack.c.bf16 %v1418_v30, %v1417_v48  ;;  %v1610_v29 = vld [vmem:[#allocation5 + $0xb0] sm:$0xff] }
 0x328   :  { %v1246_v60 = vpop.f32.mrb[12].mxu1 }
 0x329   :  { %v1247_v62 = vadd.f32 %v1246_v60, %v1150_v47  ;;  %v1248_v45 = vpop.f32.mrb[13].mxu1  ;;  %v1421_v47 = vld [vmem:[#allocation5 + $0x40] sm:$0xff] }
 0x32a   :  { %v2305_v51 = vpack.c.bf16 %v1422_v49, %v1421_v47  ;;  %v1613_v45 = vld [vmem:[#allocation5 + $0xc8] sm:$0xff] }
 0x32c   :  { %v1251_v0 = vpop.f32.mrb[14].mxu1 }
 0x32d   :  { %v1252_v1 = vadd.f32 %v1251_v0, %v1155_v50  ;;  %v1253_v14 = vpop.f32.mrb[15].mxu1 }
 0x32e   :  { %v1615_v14 = vld [vmem:[#allocation5 + $0xd8] sm:$0xff] }
 0x330   :  { %v1256_v2 = vpop.f32.mrb[16].mxu1 }
 0x331   :  { %v1257_v32 = vadd.f32 %v1256_v2, %v1160_v52  ;;  %v1258_v42 = vpop.f32.mrb[17].mxu1  ;;  %v1608_v52 = vld [vmem:[#allocation5 + $0xa0] sm:$0xff] }
 0x332   :  { %v2308_v34 = vpack.c.bf16 %v1609_v53, %v1608_v52  ;;  %v1617_v42 = vld [vmem:[#allocation5 + $0xe8] sm:$0xff] }
 0x334   :  { %v1261_v4 = vpop.f32.mrb[18].mxu1 }
 0x335   :  { %v1262_v9 = vadd.f32 %v1261_v4, %v1165_v55  ;;  %v1263_v10 = vpop.f32.mrb[19].mxu1 }
 0x348   :  { %v1356_v43 = vpop.f32.mrb[20].mxu1 }
 0x349   :  { %v1380_v12 = vadd.f32 %v1356_v43, %v1242_v57  ;;  %v1358_v26 = vpop.f32.mrb[21].mxu1  ;;  %v1611_v57 = vld [vmem:[#allocation5 + $0xb8] sm:$0xff] }
 0x34a   :  { %v2311_v60 = vpack.c.bf16 %v1611_v57, %v1610_v29  ;;  %v1727_v26 = vld [vmem:[#allocation7 + $0x18] sm:$0xff] }
 0x34b   :  { %v1392_v50 = vadd.f32 %v3317_v17, %v1380_v12  ;;  %v1726_v12 = vld [vmem:[#allocation7 + $0x10] sm:$0xff] }
 0x34c   :  { %v1361_v13 = vpop.f32.mrb[22].mxu1 }
 0x34d   :  { %v1381_v33 = vadd.f32 %v1361_v13, %v1247_v62  ;;  %v1363_v37 = vpop.f32.mrb[23].mxu1  ;;  %v1403_v55 = vmul.f32 %v3320_v58, %v1392_v50  ;;  %vm1397_vm8 = vcmp.gt.f32.partialorder %v1392_v50, 0.0  ;;  %v1612_v62 = vld [vmem:[#allocation5 + $0xc0] sm:$0xff]  ;;  %v2326_v13 = vpack.c.bf16 %v1727_v26, %v1726_v12 }
 0x34e   :  { %v2314_v0 = vpack.c.bf16 %v1613_v45, %v1612_v62  ;;  %v1729_v37 = vld [vmem:[#allocation7 + $0x28] sm:$0xff]  ;;  %v1979_v62 = vld [vmem:[%s3400_s8] ss:$0 sm:$0xff] }
 0x34f   :  { %v1393_v54 = vadd.f32 %v3317_v17, %v1381_v33  ;;  %v1408_v59 = vsel %vm1397_vm8, %v1392_v50, %v1403_v55  ;;  %2327 = vmatpush3.bf16.msra.mxu0 %v2326_v13  ;;  %v1728_v33 = vld [vmem:[#allocation7 + $0x20] sm:$0xff] }
 0x350   :  { %v1366_v18 = vpop.f32.mrb[24].mxu1  ;;  %2328 = vmatprep.subr.bf16.mxu0 %v2515_v11  ;;  %v2329_v15 = vpack.c.bf16 %v1729_v37, %v1728_v33 }
 0x351   :  { %vm1398_vm3 = vcmp.gt.f32.partialorder %v1393_v54, 0.0  ;;  %v1404_v5 = vmul.f32 %v3320_v58, %v1393_v54  ;;  %v1382_v22 = vadd.f32 %v1366_v18, %v1252_v1  ;;  %v1368_v23 = vpop.f32.mrb[25].mxu1  ;;  %v1614_v1 = vld [vmem:[#allocation5 + $0xd0] sm:$0xff]  ;;  %v1733_v18 = vld [vmem:[#allocation7 + $0x48] sm:$0xff] }
 0x352   :  { %v2317_v2 = vpack.c.bf16 %v1615_v14, %v1614_v1 }
 0x353   :  { %v1409_v20 = vsel %vm1398_vm3, %v1393_v54, %v1404_v5  ;;  %v1394_v8 = vadd.f32 %v3317_v17, %v1382_v22  ;;  %2330 = vmatpush3.bf16.msra.mxu0 %v2329_v15  ;;  %v1734_v5 = vld [vmem:[#allocation7 + $0x50] sm:$0xff]  ;;  %v1735_v22 = vld [vmem:[#allocation7 + $0x58] sm:$0xff]  ;;  %v1849_v15 = vand.u32 127, %v673_v27 }
 0x354   :  { %v1371_v3 = vpop.f32.mrb[26].mxu1  ;;  %2058 = vmatmul.mubr.msk.f32.vlgmr.msra.gmra.mrb[30].mxu1 %vm1434_vm4, %v1409_v20  ;;  %2331 = vmatprep.subr.bf16.mxu0 %v2515_v11  ;;  %v2338_v23 = vpack.c.bf16 %v1735_v22, %v1734_v5 }
 0x355   :  { %v1405_v28 = vmul.f32 %v3320_v58, %v1394_v8  ;;  %v1383_v36 = vadd.f32 %v1371_v3, %v1257_v32  ;;  %2294 = vmatpush3.bf16.msra.mxu1 %v2293_v19  ;;  %v1373_v38 = vpop.f32.mrb[27].mxu1  ;;  %2060 = vmatprep.mubr.msk.f32.mxu1 %vm2519_vm11, %v2514_v7  ;;  %vm1399_vm6 = vcmp.gt.f32.partialorder %v1394_v8, 0.0  ;;  %v1616_v32 = vld [vmem:[#allocation5 + $0xe0] sm:$0xff]  ;;  %vm1850_vm15 = vcmp.eq.s32.totalorder %v1849_v15, 0 }
 0x356   :  { %2295 = vmatprep.subr.bf16.mxu1 %v2515_v11  ;;  %v2320_v4 = vpack.c.bf16 %v1617_v42, %v1616_v32  ;;  %vm1851_vm0 = vcmp.eq.s32.totalorder %v1849_v15, 5  ;;  %vm1853_vm1 = vcmp.eq.s32.totalorder %v1849_v15, 10 }
 0x357   :  { %v1395_v31 = vadd.f32 %v3317_v17, %v1383_v36  ;;  %v1410_v35 = vsel %vm1399_vm6, %v1394_v8, %v1405_v28  ;;  %vm1852_vm5 = vmor %vm1850_vm15, %vm1851_vm0 }
 0x358   :  { %v1376_v21 = vpop.f32.mrb[28].mxu1  ;;  %2061 = vmatmul.mubr.msk.f32.gmra.mrb[32].mxu1 %vm1434_vm4, %v1410_v35  ;;  %vm1854_vm2 = vmor %vm1852_vm5, %vm1853_vm1 }
 0x359   :  { %v1406_v24 = vmul.f32 %v3320_v58, %v1395_v31  ;;  %v1384_v61 = vadd.f32 %v1376_v21, %v1262_v9  ;;  %2297 = vmatpush3.bf16.msra.mxu1 %v2296_v63  ;;  %v1378_v39 = vpop.f32.mrb[29].mxu1  ;;  %2063 = vmatprep.mubr.msk.f32.mxu1 %vm2519_vm11, %v2514_v7  ;;  %vm1400_vm7 = vcmp.gt.f32.partialorder %v1395_v31, 0.0 }
 0x35a   :  { %2298 = vmatprep.subr.bf16.mxu1 %v2515_v11 }
 0x35b   :  { %v1411_v44 = vsel %vm1400_vm7, %v1395_v31, %v1406_v24  ;;  %v1396_v9 = vadd.f32 %v3317_v17, %v1384_v61  ;;  %v1731_v17 = vld [vmem:[#allocation7 + $0x38] sm:$0xff]  ;;  %v1978_v61 = vld [vmem:[%s3398_s6] ss:$0 sm:$0xff] }
 0x35c   :  { %2064 = vmatmul.mubr.msk.f32.gmra.mrb[34].mxu1 %vm1434_vm4, %v1411_v44  ;;  %v2332_v54 = vpack.c.bf16 %v1731_v17, %v1730_v16 }
 0x35d   :  { %2300 = vmatpush3.bf16.msra.mxu1 %v2299_v56  ;;  %2086 = vmatprep.mubr.msk.f32.mxu1 %vm2519_vm11, %v2514_v7  ;;  %v1407_v10 = vmul.f32 %v3320_v58, %v1396_v9  ;;  %vm1401_vm9 = vcmp.gt.f32.partialorder %v1396_v9, 0.0  ;;  %v1732_v58 = vld [vmem:[#allocation7 + $0x40] sm:$0xff] }
 0x35e   :  { %2301 = vmatprep.subr.bf16.mxu1 %v2515_v11  ;;  %2333 = vmatpush3.bf16.msra.mxu0 %v2332_v54  ;;  %v2335_v19 = vpack.c.bf16 %v1733_v18, %v1732_v58 }
 0x35f   :  { %v1412_v43 = vsel %vm1401_vm9, %v1396_v9, %v1407_v10  ;;  %2334 = vmatprep.subr.bf16.mxu0 %v2515_v11 }
 0x361   :  { %2303 = vmatpush3.bf16.msra.mxu1 %v2302_v46 }
 0x362   :  { %2304 = vmatprep.subr.bf16.mxu1 %v2515_v11  ;;  %2336 = vmatpush3.bf16.msra.mxu0 %v2335_v19 }
 0x363   :  { %2337 = vmatprep.subr.bf16.mxu0 %v2515_v11 }
 0x365   :  { %2306 = vmatpush3.bf16.msra.mxu1 %v2305_v51 }
 0x366   :  { %2307 = vmatprep.subr.bf16.mxu1 %v2515_v11  ;;  %2339 = vmatpush3.bf16.msra.mxu0 %v2338_v23 }
 0x368   :  { %2087 = vmatmul.mubr.msk.f32.vlgmr.msra.gmra.mrb[36].mxu1 %vm1434_vm4, %v1408_v59 }
 0x369   :  { %2309 = vmatpush3.bf16.msra.mxu1 %v2308_v34  ;;  %2089 = vmatprep.mubr.msk.f32.mxu1 %vm2519_vm11, %v2514_v7 }
 0x36a   :  { %2310 = vmatprep.subr.bf16.mxu1 %v2515_v11 }
 0x36c   :  { %2090 = vmatmul.mubr.msk.f32.gmra.mrb[38].mxu1 %vm1434_vm4, %v1409_v20 }
 0x36d   :  { %2312 = vmatpush3.bf16.msra.mxu1 %v2311_v60  ;;  %2092 = vmatprep.mubr.msk.f32.mxu1 %vm2519_vm11, %v2514_v7 }
 0x36e   :  { %2313 = vmatprep.subr.bf16.mxu1 %v2515_v11 }
 0x370   :  { %2093 = vmatmul.mubr.msk.f32.gmra.mrb[40].mxu1 %vm1434_vm4, %v1410_v35 }
 0x371   :  { %2315 = vmatpush3.bf16.msra.mxu1 %v2314_v0  ;;  %2115 = vmatprep.mubr.msk.f32.mxu1 %vm2519_vm11, %v2514_v7 }
 0x372   :  { %2316 = vmatprep.subr.bf16.mxu1 %v2515_v11 }
 0x375   :  { %2318 = vmatpush3.bf16.msra.mxu1 %v2317_v2 }
 0x376   :  { %2319 = vmatprep.subr.bf16.mxu1 %v2515_v11 }
 0x379   :  { %2321 = vmatpush3.bf16.msra.mxu1 %v2320_v4 }
 0x37c   :  { %2116 = vmatmul.mubr.msk.f32.vlgmr.msra.gmra.mrb[42].mxu1 %vm1434_vm4, %v1410_v35 }
 0x37d   :  { %2118 = vmatprep.mubr.msk.f32.mxu1 %vm2519_vm11, %v2514_v7 }
 0x380   :  { %2119 = vmatmul.mubr.msk.f32.gmra.mrb[44].mxu1 %vm1434_vm4, %v1411_v44 }
 0x381   :  { %2121 = vmatprep.mubr.msk.f32.mxu1 %vm2519_vm11, %v2514_v7 }
 0x384   :  { %2122 = vmatmul.mubr.msk.f32.gmra.mrb[46].mxu1 %vm1434_vm4, %v1412_v43 }
 0x427   :  { %v1510_v25 = vpop.f32.mrb[30].mxu1 }
 0x428   :  { %v2059_v6 = vpop.f32.mrb[31].mxu1 }
 0x42b   :  { %v1515_v20 = vpop.f32.mrb[32].mxu1 }
 0x42c   :  { %v2062_v8 = vpop.f32.mrb[33].mxu1 }
 0x42f   :  { %v1520_v3 = vpop.f32.mrb[34].mxu1 }
 0x430   :  { %v2065_v28 = vpop.f32.mrb[35].mxu1 }
 0x43b   :  { %v1593_v36 = vpop.f32.mrb[36].mxu1 }
 0x43c   :  { %v1594_v38 = vadd.f32 %v1593_v36, %v1510_v25  ;;  %v2088_v63 = vpop.f32.mrb[37].mxu1 }
 0x43f   :  { %v1598_v48 = vpop.f32.mrb[38].mxu1 }
 0x440   :  { %v1599_v30 = vadd.f32 %v1598_v48, %v1515_v20  ;;  %v2091_v31 = vpop.f32.mrb[39].mxu1 }
 0x443   :  { %v1603_v35 = vpop.f32.mrb[40].mxu1 }
 0x444   :  { %v1604_v21 = vadd.f32 %v1603_v35, %v1520_v3  ;;  %v2094_v24 = vpop.f32.mrb[41].mxu1 }
 0x44f   :  { %v1687_v11 = vpop.f32.mrb[42].mxu1 }
 0x450   :  { %v1701_v39 = vadd.f32 %v1687_v11, %v1594_v38  ;;  %v2117_v56 = vpop.f32.mrb[43].mxu1 }
 0x452   :  { %v1711_v41 = vadd.f32 %v1978_v61, %v1701_v39 }
 0x453   :  { %v1692_v44 = vpop.f32.mrb[44].mxu1 }
 0x454   :  { %vm1714_vm10 = vcmp.gt.f32.partialorder %v1711_v41, 0.0  ;;  %v1718_v46 = vmul.f32 %v1717_v40, %v1711_v41  ;;  %v1702_v47 = vadd.f32 %v1692_v44, %v1599_v30  ;;  %v2120_v49 = vpop.f32.mrb[45].mxu1 }
 0x456   :  { %v1721_v50 = vsel %vm1714_vm10, %v1711_v41, %v1718_v46  ;;  %v1712_v51 = vadd.f32 %v1978_v61, %v1702_v47 }
 0x457   :  { %v1697_v52 = vpop.f32.mrb[46].mxu1  ;;  %2149 = vmatmul.mubr.msk.f32.vlgmr.msra.gmra.mrb[28].mxu0 %vm1743_vm12, %v1721_v50 }
 0x458   :  { %v1719_v53 = vmul.f32 %v1717_v40, %v1712_v51  ;;  %v1703_v55 = vadd.f32 %v1697_v52, %v1604_v21  ;;  %v2123_v34 = vpop.f32.mrb[47].mxu1  ;;  %2151 = vmatprep.mubr.msk.f32.mxu0 %vm2519_vm11, %v2514_v7  ;;  %vm1715_vm13 = vcmp.gt.f32.partialorder %v1712_v51, 0.0 }
 0x45a   :  { %v1713_v29 = vadd.f32 %v1978_v61, %v1703_v55  ;;  %v1722_v57 = vsel %vm1715_vm13, %v1712_v51, %v1719_v53 }
 0x45b   :  { %2152 = vmatmul.mubr.msk.f32.gmra.mrb[30].mxu0 %vm1743_vm12, %v1722_v57 }
 0x45c   :  { %v1720_v59 = vmul.f32 %v1717_v40, %v1713_v29  ;;  %2154 = vmatprep.mubr.msk.f32.mxu0 %vm2519_vm11, %v2514_v7  ;;  %vm1716_vm14 = vcmp.gt.f32.partialorder %v1713_v29, 0.0  ;;  %vm1858_vm11 = vcmask 121856  }
 0x45e   :  { %v1723_v60 = vsel %vm1716_vm14, %v1713_v29, %v1720_v59 }
 0x45f   :  { %2155 = vmatmul.mubr.msk.f32.gmra.mrb[32].mxu0 %vm1743_vm12, %v1723_v60 }
 0x52a   :  { %v1819_v45 = vpop.f32.mrb[28].mxu0 }
 0x52b   :  { %v1820_v0 = vadd.f32 %v1979_v62, %v1819_v45  ;;  %v2150_v1 = vpop.f32.mrb[29].mxu0 }
 0x52d   :  { %v1833_v14 = vsub.f32 0.0, %v1820_v0 }
 0x52e   :  { %v1824_v2 = vpop.f32.mrb[30].mxu0 }
 0x52f   :  { %v1836_v32 = vmul.f32 1.442695, %v1833_v14  ;;  %v1825_v42 = vadd.f32 %v1979_v62, %v1824_v2  ;;  %v2153_v4 = vpop.f32.mrb[31].mxu0 }
 0x531   :  { %2410 = vpow2.f32 %v1836_v32  ;;  %v1834_v9 = vsub.f32 0.0, %v1825_v42 }
 0x532   :  { %v1829_v10 = vpop.f32.mrb[32].mxu0 }
 0x533   :  { %v1838_v7 = vmul.f32 1.442695, %v1834_v9  ;;  %v1830_v43 = vadd.f32 %v1979_v62, %v1829_v10  ;;  %v2156_v12 = vpop.f32.mrb[33].mxu0 }
 0x535   :  { %2412 = vpow2.f32 %v1838_v7  ;;  %v1835_v26 = vsub.f32 0.0, %v1830_v43 }
 0x537   :  { %v1840_v13 = vmul.f32 1.442695, %v1835_v26 }
 0x539   :  { %2414 = vpow2.f32 %v1840_v13 }
 0x53b   :  { %v2411_v33 = vpop.eup %2410 }
 0x53c   :  { %v1842_v37 = vadd.f32 1.0, %v2411_v33 }
 0x53e   :  { %2416 = vrcp.f32 %v1842_v37 }
 0x53f   :  { %v2413_v16 = vpop.eup %2412 }
 0x540   :  { %v1843_v17 = vadd.f32 1.0, %v2413_v16 }
 0x542   :  { %2418 = vrcp.f32 %v1843_v17 }
 0x543   :  { %v2415_v54 = vpop.eup %2414 }
 0x544   :  { %v1844_v58 = vadd.f32 1.0, %v2415_v54 }
 0x546   :  { %2420 = vrcp.f32 %v1844_v58 }
 0x548   :  { %v2417_v18 = vpop.eup %2416 }
 0x549   :  { %v1855_v19 = vsel %vm1854_vm2, %v2417_v18, %v1820_v0 }
 0x54a   :  { %1859 = vst.msk [vmem:[%s3402_s10] sm:$0xff] %vm1858_vm11, %v1855_v19 }
 0x54c   :  { %v2419_v27 = vpop.eup %2418 }
 0x54d   :  { %v1856_v5 = vsel %vm1854_vm2, %v2419_v27, %v1825_v42 }
 0x54e   :  { %1860 = vst.msk [vmem:[%s3402_s10 + $0x8] sm:$0xff] %vm1858_vm11, %v1856_v5 }
 0x550   :  { %v2421_v22 = vpop.eup %2420 }
 0x551   :  { %v1857_v23 = vsel %vm1854_vm2, %v2421_v22, %v1830_v43 }
 0x552   :  { %1861 = vst.msk [vmem:[%s3402_s10 + $0x10] sm:$0xff] %vm1858_vm11, %v1857_v23 }
 0x553   :  { %1866 = vsyncpa [#allocation3], 1 }
 0x554   :  { %1867 = vsyncpa [#allocation6], 1 }
 0x555   :  { %1868 = vsyncpa [#allocation4], 1 }

</bundles_post_ra>
